<compile_context>
chip_gen: v6e
topology: v6e:2x2x1
jax: 0.10.0
libtpu: 0.0.40
codegen_flags: <defaults>
</compile_context>

<pallas_src>
import functools

import jax
import jax.numpy as jnp
from jax import lax
from jax.experimental import pallas as pl
from jax.experimental.pallas import tpu as pltpu

_VMEM_LIMIT = 48 * 1024 * 1024  # safe on v5e/v6e (128 MiB) and v7x (64 MiB)


# ----------------------------- small helpers ---------------------------------

def _round_up(x, m):
    return ((x + m - 1) // m) * m


def _pick_tile(n, target, align):
    """Largest tile <= target that divides n and is `align`-aligned; else n."""
    if n <= target:
        return n
    for t in range(target, align - 1, -1):
        if t % align == 0 and n % t == 0:
            return t
    return n


def _layernorm(x, gamma, beta, eps):
    mu = jnp.mean(x, axis=-1, keepdims=True)
    var = jnp.mean((x - mu) ** 2, axis=-1, keepdims=True)
    return (x - mu) * lax.rsqrt(var + eps) * gamma + beta


def _gelu_tanh(x):
    # matches torch.nn.functional.gelu(approximate='tanh')
    c = 0.7978845608028654  # sqrt(2/pi)
    return 0.5 * x * (1.0 + jnp.tanh(c * (x + 0.044715 * x * x * x)))


# ----------------------------- patch embedding kernel ------------------------

def _patch_embed_kernel(p_ref, w_ref, b_ref, pos_ref, out_ref):
    x = p_ref[0].astype(jnp.bfloat16)                            # (tn, Kp)
    y = jnp.dot(x, w_ref[...], preferred_element_type=jnp.float32)
    y = y + b_ref[...].astype(jnp.float32) + pos_ref[...].astype(jnp.float32)
    out_ref[0] = y.astype(out_ref.dtype)


def patch_embed(patches, w, b, pos, *, row_tile=256):
    B, N, Kp = patches.shape
    D = w.shape[1]
    tn = _pick_tile(N, row_tile, 8)
    return pl.pallas_call(
        _patch_embed_kernel,
        out_shape=jax.ShapeDtypeStruct((B, N, D), jnp.float32),
        grid=(B, N // tn),
        in_specs=[
            pl.BlockSpec((1, tn, Kp), lambda bi, ni: (bi, ni, 0)),
            pl.BlockSpec((Kp, D), lambda bi, ni: (0, 0)),
            pl.BlockSpec((1, D), lambda bi, ni: (0, 0)),
            pl.BlockSpec((tn, D), lambda bi, ni: (ni, 0)),
        ],
        out_specs=pl.BlockSpec((1, tn, D), lambda bi, ni: (bi, ni, 0)),
        compiler_params=pltpu.CompilerParams(
            dimension_semantics=("parallel", "parallel"),
            vmem_limit_bytes=_VMEM_LIMIT),
    )(patches, w, b, pos)


# ----------------------------- LN1 + QKV projection kernel -------------------

def _qkv_kernel(x_ref, g_ref, bb_ref, wq_ref, bq_ref, wk_ref, bk_ref,
                wv_ref, bv_ref, q_ref, k_ref, v_ref, *, eps):
    x = x_ref[0]                                                 # (tn, D) fp32
    h = _layernorm(x, g_ref[...], bb_ref[...], eps).astype(jnp.bfloat16)

    def proj(w_r, b_r):
        y = jnp.dot(h, w_r[...], preferred_element_type=jnp.float32)
        return (y + b_r[...].astype(jnp.float32)).astype(jnp.bfloat16)

    q_ref[0] = proj(wq_ref, bq_ref)   # wq/bq already carry the 1/sqrt(hd) scale
    k_ref[0] = proj(wk_ref, bk_ref)
    v_ref[0] = proj(wv_ref, bv_ref)


def qkv_project(x, lp, *, eps, row_tile=256):
    B, N, D = x.shape
    tn = _pick_tile(N, row_tile, 8)
    row3 = pl.BlockSpec((1, tn, D), lambda bi, ni: (bi, ni, 0))
    const2 = lambda shp: pl.BlockSpec(shp, lambda bi, ni: (0, 0))
    in_specs = [row3, const2((1, D)), const2((1, D)),
                const2((D, D)), const2((1, D)),
                const2((D, D)), const2((1, D)),
                const2((D, D)), const2((1, D))]
    return pl.pallas_call(
        functools.partial(_qkv_kernel, eps=eps),
        out_shape=tuple(jax.ShapeDtypeStruct((B, N, D), jnp.bfloat16)
                        for _ in range(3)),
        grid=(B, N // tn),
        in_specs=in_specs,
        out_specs=(row3, row3, row3),
        compiler_params=pltpu.CompilerParams(
            dimension_semantics=("parallel", "parallel"),
            vmem_limit_bytes=_VMEM_LIMIT),
    )(x, lp["ln1_g"], lp["ln1_b"], lp["wq"], lp["bq"],
      lp["wk"], lp["bk"], lp["wv"], lp["bv"])


# ----------------------------- attention + out-proj + residual kernel --------
# grid = (B, query tiles, heads); heads are a reduction axis: each step adds
# softmax(q_h k_h^T) v_h @ Wo_h into the (tq, D) output tile (initialized with
# the residual + out-proj bias at head 0).  No head concat, no lane slicing.

def _attn_kernel(x_ref, q_ref, k_ref, v_ref, wo_ref, bo_ref, out_ref):
    h = pl.program_id(2)

    @pl.when(h == 0)
    def _():
        out_ref[0] = x_ref[0] + bo_ref[...].astype(jnp.float32)  # residual + bias

    qh = q_ref[0, 0]                                             # (tq, hd) bf16
    kh = k_ref[0, 0]                                             # (N,  hd) bf16
    vh = v_ref[0, 0]                                             # (N,  hd) bf16

    # scores: contract last dims; no materialized transpose of K.
    s = lax.dot_general(qh, kh, (((1,), (1,)), ((), ())),
                        preferred_element_type=jnp.float32)      # (tq, N)
    s = s - jnp.max(s, axis=-1, keepdims=True)
    p = jnp.exp(s)
    p = p * pl.reciprocal(jnp.sum(p, axis=-1, keepdims=True), approx=True)

    ctx = jnp.dot(p.astype(jnp.bfloat16), vh,
                  preferred_element_type=jnp.float32)            # (tq, hd)
    out_ref[0] += jnp.dot(ctx.astype(jnp.bfloat16), wo_ref[0],
                          preferred_element_type=jnp.float32)    # (tq, D)


def attention_block(x, q, k, v, wo, bo, *, row_tile=256):
    B, N, D = x.shape
    _, H, _, hd = q.shape
    tq = _pick_tile(N, row_tile, 8)
    in_specs = [
        pl.BlockSpec((1, tq, D), lambda bi, qi, hi: (bi, qi, 0)),      # residual
        pl.BlockSpec((1, 1, tq, hd), lambda bi, qi, hi: (bi, hi, qi, 0)),
        pl.BlockSpec((1, 1, N, hd), lambda bi, qi, hi: (bi, hi, 0, 0)),
        pl.BlockSpec((1, 1, N, hd), lambda bi, qi, hi: (bi, hi, 0, 0)),
        pl.BlockSpec((1, hd, D), lambda bi, qi, hi: (hi, 0, 0)),       # Wo_h
        pl.BlockSpec((1, D), lambda bi, qi, hi: (0, 0)),               # bo
    ]
    return pl.pallas_call(
        _attn_kernel,
        out_shape=jax.ShapeDtypeStruct((B, N, D), jnp.float32),
        grid=(B, N // tq, H),
        in_specs=in_specs,
        out_specs=pl.BlockSpec((1, tq, D), lambda bi, qi, hi: (bi, qi, 0)),
        compiler_params=pltpu.CompilerParams(
            dimension_semantics=("parallel", "parallel", "arbitrary"),
            vmem_limit_bytes=_VMEM_LIMIT),
    )(x, q, k, v, wo, bo)


# ----------------------------- LN2 + MLP + residual kernel -------------------
# grid = (B, N tiles, I tiles); the intermediate dim is a reduction axis, so
# only a (tn, ti) slab of the MLP intermediate plus one (D, ti)/(ti, D) weight
# tile is live per step.  LN2(x) is computed once per row tile into scratch.

def _mlp_kernel(x_ref, g_ref, bb_ref, w1_ref, b1_ref, w2_ref, b2_ref,
                out_ref, h_scratch, *, eps):
    i = pl.program_id(2)

    @pl.when(i == 0)
    def _():
        x = x_ref[0]
        h_scratch[...] = _layernorm(x, g_ref[...], bb_ref[...],
                                    eps).astype(jnp.bfloat16)
        out_ref[0] = x + b2_ref[...].astype(jnp.float32)         # residual + fc2 bias

    m = jnp.dot(h_scratch[...], w1_ref[...],
                preferred_element_type=jnp.float32)              # (tn, ti)
    m = _gelu_tanh(m + b1_ref[...].astype(jnp.float32))
    out_ref[0] += jnp.dot(m.astype(jnp.bfloat16), w2_ref[...],
                          preferred_element_type=jnp.float32)


def mlp_block(x, lp, *, eps, row_tile=256, inter_tile=512):
    B, N, D = x.shape
    I = lp["w1"].shape[1]
    tn = _pick_tile(N, row_tile, 8)
    ti = _pick_tile(I, inter_tile, 128)
    in_specs = [
        pl.BlockSpec((1, tn, D), lambda bi, ni, ii: (bi, ni, 0)),
        pl.BlockSpec((1, D), lambda bi, ni, ii: (0, 0)),
        pl.BlockSpec((1, D), lambda bi, ni, ii: (0, 0)),
        pl.BlockSpec((D, ti), lambda bi, ni, ii: (0, ii)),
        pl.BlockSpec((1, ti), lambda bi, ni, ii: (0, ii)),
        pl.BlockSpec((ti, D), lambda bi, ni, ii: (ii, 0)),
        pl.BlockSpec((1, D), lambda bi, ni, ii: (0, 0)),
    ]
    return pl.pallas_call(
        functools.partial(_mlp_kernel, eps=eps),
        out_shape=jax.ShapeDtypeStruct((B, N, D), jnp.float32),
        grid=(B, N // tn, I // ti),
        in_specs=in_specs,
        out_specs=pl.BlockSpec((1, tn, D), lambda bi, ni, ii: (bi, ni, 0)),
        scratch_shapes=[pltpu.VMEM((tn, D), jnp.bfloat16)],
        compiler_params=pltpu.CompilerParams(
            dimension_semantics=("parallel", "parallel", "arbitrary"),
            vmem_limit_bytes=_VMEM_LIMIT),
    )(x, lp["ln2_g"], lp["ln2_b"], lp["w1"], lp["b1"], lp["w2"], lp["b2"])


# ----------------------------- post-layernorm kernel -------------------------

def _post_ln_kernel(x_ref, g_ref, b_ref, out_ref, *, eps):
    x = x_ref[0]
    out_ref[0] = _layernorm(x, g_ref[...], b_ref[...], eps).astype(out_ref.dtype)


def post_layernorm(x, g, b, *, eps, row_tile=256):
    B, N, D = x.shape
    tn = _pick_tile(N, row_tile, 8)
    return pl.pallas_call(
        functools.partial(_post_ln_kernel, eps=eps),
        out_shape=jax.ShapeDtypeStruct((B, N, D), jnp.float32),
        grid=(B, N // tn),
        in_specs=[
            pl.BlockSpec((1, tn, D), lambda bi, ni: (bi, ni, 0)),
            pl.BlockSpec((1, D), lambda bi, ni: (0, 0)),
            pl.BlockSpec((1, D), lambda bi, ni: (0, 0)),
        ],
        out_specs=pl.BlockSpec((1, tn, D), lambda bi, ni: (bi, ni, 0)),
        compiler_params=pltpu.CompilerParams(
            dimension_semantics=("parallel", "parallel"),
            vmem_limit_bytes=_VMEM_LIMIT),
    )(x, g, b)


# ----------------------------- model: params + forward -----------------------

def init_params(key, cfg):
    D, I = cfg["hidden_size"], cfg["intermediate_size"]
    C, P = cfg["num_channels"], cfg["patch_size"]
    H = cfg["num_attention_heads"]
    hd = D // H
    N = (cfg["image_size"] // P) ** 2
    K = C * P * P
    Kp = _round_up(K, 128)                 # pad contraction dim for the MXU
    scale = 0.05

    def nrm(k, shp):
        return (scale * jax.random.normal(k, shp, dtype=jnp.float32)
                ).astype(jnp.bfloat16)

    keys = jax.random.split(key, 3 + 10 * cfg["num_hidden_layers"])
    patch_w = jnp.pad(nrm(keys[0], (K, D)), ((0, Kp - K), (0, 0)))
    params = {
        # nn.Conv2d weight (D, C, P, P) flattened & transposed to (K, D), zero
        # padded along K up to Kp.
        "patch_w": patch_w,
        "patch_b": nrm(keys[1], (1, D)),
        "pos": nrm(keys[2], (N, D)),       # nn.Embedding(N, D) gathered by arange
        "post_g": jnp.ones((1, D), jnp.float32),
        "post_b": jnp.zeros((1, D), jnp.float32),
        "layers": [],
    }
    attn_scale = jnp.float32(hd ** -0.5)
    for l in range(cfg["num_hidden_layers"]):
        k = keys[3 + 10 * l: 3 + 10 * (l + 1)]
        # q projection stored pre-scaled by 1/sqrt(head_dim) (scale folded in).
        wq = (nrm(k[0], (D, D)).astype(jnp.float32) * attn_scale).astype(jnp.bfloat16)
        bq = (nrm(k[1], (1, D)).astype(jnp.float32) * attn_scale).astype(jnp.bfloat16)
        params["layers"].append({
            "ln1_g": jnp.ones((1, D), jnp.float32),
            "ln1_b": jnp.zeros((1, D), jnp.float32),
            # nn.Linear weights stored pre-transposed to (in, out), bf16.
            "wq": wq, "bq": bq,
            "wk": nrm(k[2], (D, D)), "bk": nrm(k[3], (1, D)),
            "wv": nrm(k[4], (D, D)), "bv": nrm(k[5], (1, D)),
            # out_proj weight stored per-head: (H, head_dim, D)
            "wo": nrm(k[6], (D, D)).reshape(H, hd, D), "bo": nrm(k[7], (1, D)),
            "ln2_g": jnp.ones((1, D), jnp.float32),
            "ln2_b": jnp.zeros((1, D), jnp.float32),
            "w1": nrm(k[8], (D, I)), "b1": jnp.zeros((1, I), jnp.bfloat16),
            "w2": nrm(k[9], (I, D)), "b2": jnp.zeros((1, D), jnp.bfloat16),
        })
    return params


def extract_patches(pixel_values, patch_size, k_padded):
    """NCHW -> (B, N, Kp); patch contents flattened in (c, ph, pw) order."""
    B, C, Himg, Wimg = pixel_values.shape
    P = patch_size
    x = pixel_values.reshape(B, C, Himg // P, P, Wimg // P, P)
    x = x.transpose(0, 2, 4, 1, 3, 5)                 # (B, H/P, W/P, C, P, P)
    x = x.reshape(B, (Himg // P) * (Wimg // P), C * P * P)
    K = C * P * P
    if k_padded > K:
        x = jnp.pad(x, ((0, 0), (0, 0), (0, k_padded - K)))
    return x


def siglip_vision_forward(pixel_values, params, cfg):
    eps = cfg["layer_norm_eps"]
    H = cfg["num_attention_heads"]
    patches = extract_patches(pixel_values, cfg["patch_size"],
                              params["patch_w"].shape[0])
    x = patch_embed(patches, params["patch_w"], params["patch_b"], params["pos"])
    B, N, D = x.shape
    hd = D // H
    for lp in params["layers"]:
        q, k, v = qkv_project(x, lp, eps=eps)
        # layout plumbing (XLA side): (B, N, H*hd) -> (B, H, N, hd) so the
        # attention kernel gets lane-dense per-head blocks via BlockSpec.
        q = q.reshape(B, N, H, hd).transpose(0, 2, 1, 3)
        k = k.reshape(B, N, H, hd).transpose(0, 2, 1, 3)
        v = v.reshape(B, N, H, hd).transpose(0, 2, 1, 3)
        x = attention_block(x, q, k, v, lp["wo"], lp["bo"])
        x = mlp_block(x, lp, eps=eps)
    return post_layernorm(x, params["post_g"], params["post_b"], eps=eps)


# ----------------------------- pure-JAX reference (for sanity check) ---------

def reference_forward(pixel_values, params, cfg):
    eps = cfg["layer_norm_eps"]
    H = cfg["num_attention_heads"]

    def mm(a, w):  # bf16 matmul with f32 accumulation, mirrors kernel precision
        return jnp.dot(a.astype(jnp.bfloat16), w,
                       preferred_element_type=jnp.float32)

    patches = extract_patches(pixel_values, cfg["patch_size"],
                              params["patch_w"].shape[0])
    x = (mm(patches, params["patch_w"])
         + params["patch_b"].astype(jnp.float32)
         + params["pos"].astype(jnp.float32))
    B, N, D = x.shape
    hd = D // H
    for lp in params["layers"]:
        h = _layernorm(x, lp["ln1_g"], lp["ln1_b"], eps)
        q = (mm(h, lp["wq"]) + lp["bq"].astype(jnp.float32)).astype(jnp.bfloat16)
        k = (mm(h, lp["wk"]) + lp["bk"].astype(jnp.float32)).astype(jnp.bfloat16)
        v = (mm(h, lp["wv"]) + lp["bv"].astype(jnp.float32)).astype(jnp.bfloat16)
        q = q.reshape(B, N, H, hd).transpose(0, 2, 1, 3)
        k = k.reshape(B, N, H, hd).transpose(0, 2, 1, 3)
        v = v.reshape(B, N, H, hd).transpose(0, 2, 1, 3)
        s = jnp.einsum("bhqd,bhkd->bhqk", q, k,
                       preferred_element_type=jnp.float32)   # scale folded in wq
        p = jax.nn.softmax(s, axis=-1)
        ctx = jnp.einsum("bhqk,bhkd->bhqd", p.astype(jnp.bfloat16), v,
                         preferred_element_type=jnp.float32)
        ctx = ctx.transpose(0, 2, 1, 3).reshape(B, N, D)
        a = mm(ctx, lp["wo"].reshape(D, D)) + lp["bo"].astype(jnp.float32)
        x = x + a
        h = _layernorm(x, lp["ln2_g"], lp["ln2_b"], eps)
        m = _gelu_tanh(mm(h, lp["w1"]) + lp["b1"].astype(jnp.float32))
        x = x + mm(m, lp["w2"]) + lp["b2"].astype(jnp.float32)
    return _layernorm(x, params["post_g"], params["post_b"], eps)


# ----------------------------- main -------------------------------------------

if __name__ == "__main__":
    cfg = dict(
        hidden_size=32,
        intermediate_size=64,
        num_hidden_layers=2,
        num_attention_heads=4,
        num_channels=3,
        image_size=32,
        patch_size=8,
        layer_norm_eps=1e-6,
    )

    key = jax.random.PRNGKey(0)
    pkey, xkey = jax.random.split(key)
    params = init_params(pkey, cfg)

    # PyTorch conv input layout: NCHW
    pixel_values = jax.random.normal(
        xkey, (2, cfg["num_channels"], cfg["image_size"], cfg["image_size"]),
        dtype=jnp.float32)

    fwd = jax.jit(functools.partial(siglip_vision_forward, cfg=cfg))
    out = jax.block_until_ready(fwd(pixel_values, params))

    ref = reference_forward(pixel_values, params, cfg)
    N = (cfg["image_size"] // cfg["patch_size"]) ** 2
    assert out.shape == ref.shape == (2, N, cfg["hidden_size"])
    max_err = float(jnp.max(jnp.abs(out - ref)))
    assert jnp.allclose(out, ref, atol=5e-2, rtol=5e-2), max_err

    print("KERNEL_OK")
</pallas_src>

<mosaic_0001>
module attributes {stable_mosaic.version = 11 : i64} {
  func.func @_patch_embed_kernel(%arg0: i32, %arg1: i32, %arg2: memref<1x16x256xf32, #tpu.memory_space<vmem>>, %arg3: memref<256x32xbf16, #tpu.memory_space<vmem>>, %arg4: memref<1x32xbf16, #tpu.memory_space<vmem>>, %arg5: memref<16x32xbf16, #tpu.memory_space<vmem>>, %arg6: memref<1x16x32xf32, #tpu.memory_space<vmem>>) attributes {dimension_semantics = [#tpu.dimension_semantics<parallel>, #tpu.dimension_semantics<parallel>], iteration_bounds = array<i64: 2, 1>, scalar_prefetch = 0 : i64, scratch_operands = 0 : i64, tpu.core_type = #tpu.core_type<tc>, window_params = [{transform_indices = @transform_0, window_bounds = array<i64: 1, 16, 256>}, {pipeline_mode = #tpu.pipeline_mode<synchronous>, transform_indices = @transform_1, window_bounds = array<i64: 256, 32>}, {pipeline_mode = #tpu.pipeline_mode<synchronous>, transform_indices = @transform_2, window_bounds = array<i64: 1, 32>}, {transform_indices = @transform_3, window_bounds = array<i64: 16, 32>}, {transform_indices = @transform_4, window_bounds = array<i64: 1, 16, 32>}]} {
    %c0 = arith.constant 0 : index
    %c0_0 = arith.constant 0 : index
    %c0_1 = arith.constant 0 : index
    %0 = vector.load %arg2[%c0, %c0_0, %c0_1] : memref<1x16x256xf32, #tpu.memory_space<vmem>>, vector<1x16x256xf32>
    %1 = vector.shape_cast %0 : vector<1x16x256xf32> to vector<16x256xf32>
    %2 = arith.truncf %1 : vector<16x256xf32> to vector<16x256xbf16>
    %c0_2 = arith.constant 0 : index
    %c0_3 = arith.constant 0 : index
    %3 = vector.load %arg3[%c0_2, %c0_3] : memref<256x32xbf16, #tpu.memory_space<vmem>>, vector<256x32xbf16>
    %cst = arith.constant dense<0.000000e+00> : vector<16x32xf32>
    %4 = tpu.matmul %2, %3, %cst {dimension_numbers = #tpu.dot_dimension_numbers<[1], [0], [0], [1], [0, 0, 1, 1], [], []>} : vector<16x256xbf16>, vector<256x32xbf16>, vector<16x32xf32> -> vector<16x32xf32>
    %c0_4 = arith.constant 0 : index
    %c0_5 = arith.constant 0 : index
    %5 = vector.load %arg4[%c0_4, %c0_5] : memref<1x32xbf16, #tpu.memory_space<vmem>>, vector<1x32xbf16>
    %6 = arith.extf %5 : vector<1x32xbf16> to vector<1x32xf32>
    %7 = vector.broadcast %6 : vector<1x32xf32> to vector<16x32xf32>
    %8 = arith.addf %4, %7 : vector<16x32xf32>
    %c0_6 = arith.constant 0 : index
    %c0_7 = arith.constant 0 : index
    %9 = vector.load %arg5[%c0_6, %c0_7] : memref<16x32xbf16, #tpu.memory_space<vmem>>, vector<16x32xbf16>
    %10 = arith.extf %9 : vector<16x32xbf16> to vector<16x32xf32>
    %11 = arith.addf %8, %10 : vector<16x32xf32>
    %c0_8 = arith.constant 0 : index
    %c0_9 = arith.constant 0 : index
    %c0_10 = arith.constant 0 : index
    %12 = vector.load %arg6[%c0_8, %c0_9, %c0_10] : memref<1x16x32xf32, #tpu.memory_space<vmem>>, vector<1x16x32xf32>
    %13 = vector.shape_cast %12 : vector<1x16x32xf32> to vector<16x32xf32>
    %14 = vector.shape_cast %11 : vector<16x32xf32> to vector<1x16x32xf32>
    tpu.vector_store %arg6[%c0_8, %c0_9, %c0_10], %14 {strides = array<i32>} : memref<1x16x32xf32, #tpu.memory_space<vmem>>, vector<1x16x32xf32>,
    return
  }
  func.func @transform_0(%arg0: i32, %arg1: i32) -> (i32, i32, i32) {
    %c0_i32 = arith.constant 0 : i32
    %c0_i32_0 = arith.constant 0 : i32
    return %arg0, %arg1, %c0_i32 : i32, i32, i32
  }
  func.func @transform_1(%arg0: i32, %arg1: i32) -> (i32, i32) {
    %c0_i32 = arith.constant 0 : i32
    %c0_i32_0 = arith.constant 0 : i32
    %c0_i32_1 = arith.constant 0 : i32
    return %c0_i32, %c0_i32_0 : i32, i32
  }
  func.func @transform_2(%arg0: i32, %arg1: i32) -> (i32, i32) {
    %c0_i32 = arith.constant 0 : i32
    %c0_i32_0 = arith.constant 0 : i32
    %c0_i32_1 = arith.constant 0 : i32
    return %c0_i32, %c0_i32_0 : i32, i32
  }
  func.func @transform_3(%arg0: i32, %arg1: i32) -> (i32, i32) {
    %c0_i32 = arith.constant 0 : i32
    %c0_i32_0 = arith.constant 0 : i32
    return %arg1, %c0_i32 : i32, i32
  }
  func.func @transform_4(%arg0: i32, %arg1: i32) -> (i32, i32, i32) {
    %c0_i32 = arith.constant 0 : i32
    %c0_i32_0 = arith.constant 0 : i32
    return %arg0, %arg1, %c0_i32 : i32, i32, i32
  }
}

module attributes {stable_mosaic.version = 11 : i64} {
  func.func @_qkv_kernel(%arg0: i32, %arg1: i32, %arg2: memref<1x16x32xf32, #tpu.memory_space<vmem>>, %arg3: memref<1x32xf32, #tpu.memory_space<vmem>>, %arg4: memref<1x32xf32, #tpu.memory_space<vmem>>, %arg5: memref<32x32xbf16, #tpu.memory_space<vmem>>, %arg6: memref<1x32xbf16, #tpu.memory_space<vmem>>, %arg7: memref<32x32xbf16, #tpu.memory_space<vmem>>, %arg8: memref<1x32xbf16, #tpu.memory_space<vmem>>, %arg9: memref<32x32xbf16, #tpu.memory_space<vmem>>, %arg10: memref<1x32xbf16, #tpu.memory_space<vmem>>, %arg11: memref<1x16x32xbf16, #tpu.memory_space<vmem>>, %arg12: memref<1x16x32xbf16, #tpu.memory_space<vmem>>, %arg13: memref<1x16x32xbf16, #tpu.memory_space<vmem>>) attributes {dimension_semantics = [#tpu.dimension_semantics<parallel>, #tpu.dimension_semantics<parallel>], iteration_bounds = array<i64: 2, 1>, scalar_prefetch = 0 : i64, scratch_operands = 0 : i64, tpu.core_type = #tpu.core_type<tc>, window_params = [{transform_indices = @transform_0, window_bounds = array<i64: 1, 16, 32>}, {pipeline_mode = #tpu.pipeline_mode<synchronous>, transform_indices = @transform_1, window_bounds = array<i64: 1, 32>}, {pipeline_mode = #tpu.pipeline_mode<synchronous>, transform_indices = @transform_2, window_bounds = array<i64: 1, 32>}, {pipeline_mode = #tpu.pipeline_mode<synchronous>, transform_indices = @transform_3, window_bounds = array<i64: 32, 32>}, {pipeline_mode = #tpu.pipeline_mode<synchronous>, transform_indices = @transform_4, window_bounds = array<i64: 1, 32>}, {pipeline_mode = #tpu.pipeline_mode<synchronous>, transform_indices = @transform_5, window_bounds = array<i64: 32, 32>}, {pipeline_mode = #tpu.pipeline_mode<synchronous>, transform_indices = @transform_6, window_bounds = array<i64: 1, 32>}, {pipeline_mode = #tpu.pipeline_mode<synchronous>, transform_indices = @transform_7, window_bounds = array<i64: 32, 32>}, {pipeline_mode = #tpu.pipeline_mode<synchronous>, transform_indices = @transform_8, window_bounds = array<i64: 1, 32>}, {transform_indices = @transform_9, window_bounds = array<i64: 1, 16, 32>}, {transform_indices = @transform_10, window_bounds = array<i64: 1, 16, 32>}, {transform_indices = @transform_11, window_bounds = array<i64: 1, 16, 32>}]} {
    %c0 = arith.constant 0 : index
    %c0_0 = arith.constant 0 : index
    %c0_1 = arith.constant 0 : index
    %0 = vector.load %arg2[%c0, %c0_0, %c0_1] : memref<1x16x32xf32, #tpu.memory_space<vmem>>, vector<1x16x32xf32>
    %1 = vector.shape_cast %0 : vector<1x16x32xf32> to vector<16x32xf32>
    %c0_2 = arith.constant 0 : index
    %c0_3 = arith.constant 0 : index
    %2 = vector.load %arg3[%c0_2, %c0_3] : memref<1x32xf32, #tpu.memory_space<vmem>>, vector<1x32xf32>
    %c0_4 = arith.constant 0 : index
    %c0_5 = arith.constant 0 : index
    %3 = vector.load %arg4[%c0_4, %c0_5] : memref<1x32xf32, #tpu.memory_space<vmem>>, vector<1x32xf32>
    %cst = arith.constant dense<0.000000e+00> : vector<16xf32>
    %4 = vector.multi_reduction <add>, %1, %cst [1] : vector<16x32xf32> to vector<16xf32>
    %5 = vector.shape_cast %4 : vector<16xf32> to vector<16x1xf32>
    %cst_6 = arith.constant 3.200000e+01 : f32
    %6 = vector.broadcast %cst_6 : f32 to vector<16x1xf32>
    %7 = arith.divf %5, %6 : vector<16x1xf32>
    %8 = vector.broadcast %7 : vector<16x1xf32> to vector<16x32xf32>
    %9 = arith.subf %1, %8 : vector<16x32xf32>
    %10 = arith.mulf %9, %9 : vector<16x32xf32>
    %cst_7 = arith.constant dense<0.000000e+00> : vector<16xf32>
    %11 = vector.multi_reduction <add>, %10, %cst_7 [1] : vector<16x32xf32> to vector<16xf32>
    %12 = vector.shape_cast %11 : vector<16xf32> to vector<16x1xf32>
    %cst_8 = arith.constant 3.200000e+01 : f32
    %13 = vector.broadcast %cst_8 : f32 to vector<16x1xf32>
    %14 = arith.divf %12, %13 : vector<16x1xf32>
    %15 = vector.broadcast %7 : vector<16x1xf32> to vector<16x32xf32>
    %16 = arith.subf %1, %15 : vector<16x32xf32>
    %cst_9 = arith.constant 9.99999997E-7 : f32
    %17 = vector.broadcast %cst_9 : f32 to vector<16x1xf32>
    %18 = arith.addf %14, %17 : vector<16x1xf32>
    %19 = math.rsqrt %18 : vector<16x1xf32>
    %20 = vector.broadcast %19 : vector<16x1xf32> to vector<16x32xf32>
    %21 = arith.mulf %16, %20 : vector<16x32xf32>
    %22 = vector.broadcast %2 : vector<1x32xf32> to vector<16x32xf32>
    %23 = arith.mulf %21, %22 : vector<16x32xf32>
    %24 = vector.broadcast %3 : vector<1x32xf32> to vector<16x32xf32>
    %25 = arith.addf %23, %24 : vector<16x32xf32>
    %26 = arith.truncf %25 : vector<16x32xf32> to vector<16x32xbf16>
    %c0_10 = arith.constant 0 : index
    %c0_11 = arith.constant 0 : index
    %27 = vector.load %arg5[%c0_10, %c0_11] : memref<32x32xbf16, #tpu.memory_space<vmem>>, vector<32x32xbf16>
    %cst_12 = arith.constant dense<0.000000e+00> : vector<16x32xf32>
    %28 = tpu.matmul %26, %27, %cst_12 {dimension_numbers = #tpu.dot_dimension_numbers<[1], [0], [0], [1], [0, 0, 1, 1], [], []>} : vector<16x32xbf16>, vector<32x32xbf16>, vector<16x32xf32> -> vector<16x32xf32>
    %c0_13 = arith.constant 0 : index
    %c0_14 = arith.constant 0 : index
    %29 = vector.load %arg6[%c0_13, %c0_14] : memref<1x32xbf16, #tpu.memory_space<vmem>>, vector<1x32xbf16>
    %30 = arith.extf %29 : vector<1x32xbf16> to vector<1x32xf32>
    %31 = vector.broadcast %30 : vector<1x32xf32> to vector<16x32xf32>
    %32 = arith.addf %28, %31 : vector<16x32xf32>
    %33 = arith.truncf %32 : vector<16x32xf32> to vector<16x32xbf16>
    %c0_15 = arith.constant 0 : index
    %c0_16 = arith.constant 0 : index
    %c0_17 = arith.constant 0 : index
    %34 = vector.load %arg11[%c0_15, %c0_16, %c0_17] : memref<1x16x32xbf16, #tpu.memory_space<vmem>>, vector<1x16x32xbf16>
    %35 = vector.shape_cast %34 : vector<1x16x32xbf16> to vector<16x32xbf16>
    %36 = vector.shape_cast %33 : vector<16x32xbf16> to vector<1x16x32xbf16>
    tpu.vector_store %arg11[%c0_15, %c0_16, %c0_17], %36 {strides = array<i32>} : memref<1x16x32xbf16, #tpu.memory_space<vmem>>, vector<1x16x32xbf16>,
    %c0_18 = arith.constant 0 : index
    %c0_19 = arith.constant 0 : index
    %37 = vector.load %arg7[%c0_18, %c0_19] : memref<32x32xbf16, #tpu.memory_space<vmem>>, vector<32x32xbf16>
    %cst_20 = arith.constant dense<0.000000e+00> : vector<16x32xf32>
    %38 = tpu.matmul %26, %37, %cst_20 {dimension_numbers = #tpu.dot_dimension_numbers<[1], [0], [0], [1], [0, 0, 1, 1], [], []>} : vector<16x32xbf16>, vector<32x32xbf16>, vector<16x32xf32> -> vector<16x32xf32>
    %c0_21 = arith.constant 0 : index
    %c0_22 = arith.constant 0 : index
    %39 = vector.load %arg8[%c0_21, %c0_22] : memref<1x32xbf16, #tpu.memory_space<vmem>>, vector<1x32xbf16>
    %40 = arith.extf %39 : vector<1x32xbf16> to vector<1x32xf32>
    %41 = vector.broadcast %40 : vector<1x32xf32> to vector<16x32xf32>
    %42 = arith.addf %38, %41 : vector<16x32xf32>
    %43 = arith.truncf %42 : vector<16x32xf32> to vector<16x32xbf16>
    %c0_23 = arith.constant 0 : index
    %c0_24 = arith.constant 0 : index
    %c0_25 = arith.constant 0 : index
    %44 = vector.load %arg12[%c0_23, %c0_24, %c0_25] : memref<1x16x32xbf16, #tpu.memory_space<vmem>>, vector<1x16x32xbf16>
    %45 = vector.shape_cast %44 : vector<1x16x32xbf16> to vector<16x32xbf16>
    %46 = vector.shape_cast %43 : vector<16x32xbf16> to vector<1x16x32xbf16>
    tpu.vector_store %arg12[%c0_23, %c0_24, %c0_25], %46 {strides = array<i32>} : memref<1x16x32xbf16, #tpu.memory_space<vmem>>, vector<1x16x32xbf16>,
    %c0_26 = arith.constant 0 : index
    %c0_27 = arith.constant 0 : index
    %47 = vector.load %arg9[%c0_26, %c0_27] : memref<32x32xbf16, #tpu.memory_space<vmem>>, vector<32x32xbf16>
    %cst_28 = arith.constant dense<0.000000e+00> : vector<16x32xf32>
    %48 = tpu.matmul %26, %47, %cst_28 {dimension_numbers = #tpu.dot_dimension_numbers<[1], [0], [0], [1], [0, 0, 1, 1], [], []>} : vector<16x32xbf16>, vector<32x32xbf16>, vector<16x32xf32> -> vector<16x32xf32>
    %c0_29 = arith.constant 0 : index
    %c0_30 = arith.constant 0 : index
    %49 = vector.load %arg10[%c0_29, %c0_30] : memref<1x32xbf16, #tpu.memory_space<vmem>>, vector<1x32xbf16>
    %50 = arith.extf %49 : vector<1x32xbf16> to vector<1x32xf32>
    %51 = vector.broadcast %50 : vector<1x32xf32> to vector<16x32xf32>
    %52 = arith.addf %48, %51 : vector<16x32xf32>
    %53 = arith.truncf %52 : vector<16x32xf32> to vector<16x32xbf16>
    %c0_31 = arith.constant 0 : index
    %c0_32 = arith.constant 0 : index
    %c0_33 = arith.constant 0 : index
    %54 = vector.load %arg13[%c0_31, %c0_32, %c0_33] : memref<1x16x32xbf16, #tpu.memory_space<vmem>>, vector<1x16x32xbf16>
    %55 = vector.shape_cast %54 : vector<1x16x32xbf16> to vector<16x32xbf16>
    %56 = vector.shape_cast %53 : vector<16x32xbf16> to vector<1x16x32xbf16>
    tpu.vector_store %arg13[%c0_31, %c0_32, %c0_33], %56 {strides = array<i32>} : memref<1x16x32xbf16, #tpu.memory_space<vmem>>, vector<1x16x32xbf16>,
    return
  }
  func.func @transform_0(%arg0: i32, %arg1: i32) -> (i32, i32, i32) {
    %c0_i32 = arith.constant 0 : i32
    %c0_i32_0 = arith.constant 0 : i32
    return %arg0, %arg1, %c0_i32 : i32, i32, i32
  }
  func.func @transform_1(%arg0: i32, %arg1: i32) -> (i32, i32) {
    %c0_i32 = arith.constant 0 : i32
    %c0_i32_0 = arith.constant 0 : i32
    %c0_i32_1 = arith.constant 0 : i32
    return %c0_i32, %c0_i32_0 : i32, i32
  }
  func.func @transform_2(%arg0: i32, %arg1: i32) -> (i32, i32) {
    %c0_i32 = arith.constant 0 : i32
    %c0_i32_0 = arith.constant 0 : i32
    %c0_i32_1 = arith.constant 0 : i32
    return %c0_i32, %c0_i32_0 : i32, i32
  }
  func.func @transform_3(%arg0: i32, %arg1: i32) -> (i32, i32) {
    %c0_i32 = arith.constant 0 : i32
    %c0_i32_0 = arith.constant 0 : i32
    %c0_i32_1 = arith.constant 0 : i32
    return %c0_i32, %c0_i32_0 : i32, i32
  }
  func.func @transform_4(%arg0: i32, %arg1: i32) -> (i32, i32) {
    %c0_i32 = arith.constant 0 : i32
    %c0_i32_0 = arith.constant 0 : i32
    %c0_i32_1 = arith.constant 0 : i32
    return %c0_i32, %c0_i32_0 : i32, i32
  }
  func.func @transform_5(%arg0: i32, %arg1: i32) -> (i32, i32) {
    %c0_i32 = arith.constant 0 : i32
    %c0_i32_0 = arith.constant 0 : i32
    %c0_i32_1 = arith.constant 0 : i32
    return %c0_i32, %c0_i32_0 : i32, i32
  }
  func.func @transform_6(%arg0: i32, %arg1: i32) -> (i32, i32) {
    %c0_i32 = arith.constant 0 : i32
    %c0_i32_0 = arith.constant 0 : i32
    %c0_i32_1 = arith.constant 0 : i32
    return %c0_i32, %c0_i32_0 : i32, i32
  }
  func.func @transform_7(%arg0: i32, %arg1: i32) -> (i32, i32) {
    %c0_i32 = arith.constant 0 : i32
    %c0_i32_0 = arith.constant 0 : i32
    %c0_i32_1 = arith.constant 0 : i32
    return %c0_i32, %c0_i32_0 : i32, i32
  }
  func.func @transform_8(%arg0: i32, %arg1: i32) -> (i32, i32) {
    %c0_i32 = arith.constant 0 : i32
    %c0_i32_0 = arith.constant 0 : i32
    %c0_i32_1 = arith.constant 0 : i32
    return %c0_i32, %c0_i32_0 : i32, i32
  }
  func.func @transform_9(%arg0: i32, %arg1: i32) -> (i32, i32, i32) {
    %c0_i32 = arith.constant 0 : i32
    %c0_i32_0 = arith.constant 0 : i32
    return %arg0, %arg1, %c0_i32 : i32, i32, i32
  }
  func.func @transform_10(%arg0: i32, %arg1: i32) -> (i32, i32, i32) {
    %c0_i32 = arith.constant 0 : i32
    %c0_i32_0 = arith.constant 0 : i32
    return %arg0, %arg1, %c0_i32 : i32, i32, i32
  }
  func.func @transform_11(%arg0: i32, %arg1: i32) -> (i32, i32, i32) {
    %c0_i32 = arith.constant 0 : i32
    %c0_i32_0 = arith.constant 0 : i32
    return %arg0, %arg1, %c0_i32 : i32, i32, i32
  }
}

module attributes {stable_mosaic.version = 11 : i64} {
  func.func @_attn_kernel(%arg0: i32, %arg1: i32, %arg2: i32, %arg3: memref<1x16x32xf32, #tpu.memory_space<vmem>>, %arg4: memref<1x1x16x8xbf16, #tpu.memory_space<vmem>>, %arg5: memref<1x1x16x8xbf16, #tpu.memory_space<vmem>>, %arg6: memref<1x1x16x8xbf16, #tpu.memory_space<vmem>>, %arg7: memref<1x8x32xbf16, #tpu.memory_space<vmem>>, %arg8: memref<1x32xbf16, #tpu.memory_space<vmem>>, %arg9: memref<1x16x32xf32, #tpu.memory_space<vmem>>) attributes {dimension_semantics = [#tpu.dimension_semantics<parallel>, #tpu.dimension_semantics<parallel>, #tpu.dimension_semantics<arbitrary>], iteration_bounds = array<i64: 2, 1, 4>, scalar_prefetch = 0 : i64, scratch_operands = 0 : i64, tpu.core_type = #tpu.core_type<tc>, window_params = [{transform_indices = @transform_0, window_bounds = array<i64: 1, 16, 32>}, {transform_indices = @transform_1, window_bounds = array<i64: 1, 1, 16, 8>}, {transform_indices = @transform_2, window_bounds = array<i64: 1, 1, 16, 8>}, {transform_indices = @transform_3, window_bounds = array<i64: 1, 1, 16, 8>}, {transform_indices = @transform_4, window_bounds = array<i64: 1, 8, 32>}, {pipeline_mode = #tpu.pipeline_mode<synchronous>, transform_indices = @transform_5, window_bounds = array<i64: 1, 32>}, {transform_indices = @transform_6, window_bounds = array<i64: 1, 16, 32>}]} {
    %c0_i32 = arith.constant 0 : i32
    %0 = arith.cmpi eq, %arg2, %c0_i32 : i32
    %1 = arith.extui %0 : i1 to i32
    %c0_i32_0 = arith.constant 0 : i32
    %2 = arith.cmpi ne, %1, %c0_i32_0 : i32
    scf.if %2 {
      %c0_25 = arith.constant 0 : index
      %c0_26 = arith.constant 0 : index
      %c0_27 = arith.constant 0 : index
      %32 = vector.load %arg3[%c0_25, %c0_26, %c0_27] : memref<1x16x32xf32, #tpu.memory_space<vmem>>, vector<1x16x32xf32>
      %33 = vector.shape_cast %32 : vector<1x16x32xf32> to vector<16x32xf32>
      %c0_28 = arith.constant 0 : index
      %c0_29 = arith.constant 0 : index
      %34 = vector.load %arg8[%c0_28, %c0_29] : memref<1x32xbf16, #tpu.memory_space<vmem>>, vector<1x32xbf16>
      %35 = arith.extf %34 : vector<1x32xbf16> to vector<1x32xf32>
      %36 = vector.broadcast %35 : vector<1x32xf32> to vector<16x32xf32>
      %37 = arith.addf %33, %36 : vector<16x32xf32>
      %c0_30 = arith.constant 0 : index
      %c0_31 = arith.constant 0 : index
      %c0_32 = arith.constant 0 : index
      %38 = vector.load %arg9[%c0_30, %c0_31, %c0_32] : memref<1x16x32xf32, #tpu.memory_space<vmem>>, vector<1x16x32xf32>
      %39 = vector.shape_cast %38 : vector<1x16x32xf32> to vector<16x32xf32>
      %40 = vector.shape_cast %37 : vector<16x32xf32> to vector<1x16x32xf32>
      tpu.vector_store %arg9[%c0_30, %c0_31, %c0_32], %40 {strides = array<i32>} : memref<1x16x32xf32, #tpu.memory_space<vmem>>, vector<1x16x32xf32>,
    } else {
    }
    %c0 = arith.constant 0 : index
    %c0_1 = arith.constant 0 : index
    %c0_2 = arith.constant 0 : index
    %c0_3 = arith.constant 0 : index
    %3 = vector.load %arg4[%c0, %c0_1, %c0_2, %c0_3] : memref<1x1x16x8xbf16, #tpu.memory_space<vmem>>, vector<1x1x16x8xbf16>
    %4 = vector.shape_cast %3 : vector<1x1x16x8xbf16> to vector<16x8xbf16>
    %c0_4 = arith.constant 0 : index
    %c0_5 = arith.constant 0 : index
    %c0_6 = arith.constant 0 : index
    %c0_7 = arith.constant 0 : index
    %5 = vector.load %arg5[%c0_4, %c0_5, %c0_6, %c0_7] : memref<1x1x16x8xbf16, #tpu.memory_space<vmem>>, vector<1x1x16x8xbf16>
    %6 = vector.shape_cast %5 : vector<1x1x16x8xbf16> to vector<16x8xbf16>
    %c0_8 = arith.constant 0 : index
    %c0_9 = arith.constant 0 : index
    %c0_10 = arith.constant 0 : index
    %c0_11 = arith.constant 0 : index
    %7 = vector.load %arg6[%c0_8, %c0_9, %c0_10, %c0_11] : memref<1x1x16x8xbf16, #tpu.memory_space<vmem>>, vector<1x1x16x8xbf16>
    %8 = vector.shape_cast %7 : vector<1x1x16x8xbf16> to vector<16x8xbf16>
    %cst = arith.constant dense<0.000000e+00> : vector<16x16xf32>
    %9 = tpu.matmul %4, %6, %cst {dimension_numbers = #tpu.dot_dimension_numbers<[1], [1], [0], [0], [0, 0, 1, 0], [], []>} : vector<16x8xbf16>, vector<16x8xbf16>, vector<16x16xf32> -> vector<16x16xf32>
    %cst_12 = arith.constant dense<0xFF800000> : vector<16xf32>
    %10 = vector.multi_reduction <maximumf>, %9, %cst_12 [1] : vector<16x16xf32> to vector<16xf32>
    %11 = vector.shape_cast %10 : vector<16xf32> to vector<16x1xf32>
    %12 = vector.broadcast %11 : vector<16x1xf32> to vector<16x16xf32>
    %13 = arith.subf %9, %12 : vector<16x16xf32>
    %14 = math.exp %13 : vector<16x16xf32>
    %cst_13 = arith.constant dense<0.000000e+00> : vector<16xf32>
    %15 = vector.multi_reduction <add>, %14, %cst_13 [1] : vector<16x16xf32> to vector<16xf32>
    %16 = vector.shape_cast %15 : vector<16xf32> to vector<16x1xf32>
    %17 = tpu.reciprocal %16 {approx = true} : vector<16x1xf32> -> vector<16x1xf32>
    %18 = vector.broadcast %17 : vector<16x1xf32> to vector<16x16xf32>
    %19 = arith.mulf %14, %18 : vector<16x16xf32>
    %20 = arith.truncf %19 : vector<16x16xf32> to vector<16x16xbf16>
    %cst_14 = arith.constant dense<0.000000e+00> : vector<16x8xf32>
    %21 = tpu.matmul %20, %8, %cst_14 {dimension_numbers = #tpu.dot_dimension_numbers<[1], [0], [0], [1], [0, 0, 1, 1], [], []>} : vector<16x16xbf16>, vector<16x8xbf16>, vector<16x8xf32> -> vector<16x8xf32>
    %c0_15 = arith.constant 0 : index
    %c0_16 = arith.constant 0 : index
    %c0_17 = arith.constant 0 : index
    %22 = vector.load %arg9[%c0_15, %c0_16, %c0_17] : memref<1x16x32xf32, #tpu.memory_space<vmem>>, vector<1x16x32xf32>
    %23 = vector.shape_cast %22 : vector<1x16x32xf32> to vector<16x32xf32>
    %24 = arith.truncf %21 : vector<16x8xf32> to vector<16x8xbf16>
    %c0_18 = arith.constant 0 : index
    %c0_19 = arith.constant 0 : index
    %c0_20 = arith.constant 0 : index
    %25 = vector.load %arg7[%c0_18, %c0_19, %c0_20] : memref<1x8x32xbf16, #tpu.memory_space<vmem>>, vector<1x8x32xbf16>
    %26 = vector.shape_cast %25 : vector<1x8x32xbf16> to vector<8x32xbf16>
    %cst_21 = arith.constant dense<0.000000e+00> : vector<16x32xf32>
    %27 = tpu.matmul %24, %26, %cst_21 {dimension_numbers = #tpu.dot_dimension_numbers<[1], [0], [0], [1], [0, 0, 1, 1], [], []>} : vector<16x8xbf16>, vector<8x32xbf16>, vector<16x32xf32> -> vector<16x32xf32>
    %28 = arith.addf %23, %27 : vector<16x32xf32>
    %c0_22 = arith.constant 0 : index
    %c0_23 = arith.constant 0 : index
    %c0_24 = arith.constant 0 : index
    %29 = vector.load %arg9[%c0_22, %c0_23, %c0_24] : memref<1x16x32xf32, #tpu.memory_space<vmem>>, vector<1x16x32xf32>
    %30 = vector.shape_cast %29 : vector<1x16x32xf32> to vector<16x32xf32>
    %31 = vector.shape_cast %28 : vector<16x32xf32> to vector<1x16x32xf32>
    tpu.vector_store %arg9[%c0_22, %c0_23, %c0_24], %31 {strides = array<i32>} : memref<1x16x32xf32, #tpu.memory_space<vmem>>, vector<1x16x32xf32>,
    return
  }
  func.func @transform_0(%arg0: i32, %arg1: i32, %arg2: i32) -> (i32, i32, i32) {
    %c0_i32 = arith.constant 0 : i32
    %c0_i32_0 = arith.constant 0 : i32
    return %arg0, %arg1, %c0_i32 : i32, i32, i32
  }
  func.func @transform_1(%arg0: i32, %arg1: i32, %arg2: i32) -> (i32, i32, i32, i32) {
    %c0_i32 = arith.constant 0 : i32
    %c0_i32_0 = arith.constant 0 : i32
    return %arg0, %arg2, %arg1, %c0_i32 : i32, i32, i32, i32
  }
  func.func @transform_2(%arg0: i32, %arg1: i32, %arg2: i32) -> (i32, i32, i32, i32) {
    %c0_i32 = arith.constant 0 : i32
    %c0_i32_0 = arith.constant 0 : i32
    %c0_i32_1 = arith.constant 0 : i32
    return %arg0, %arg2, %c0_i32, %c0_i32_0 : i32, i32, i32, i32
  }
  func.func @transform_3(%arg0: i32, %arg1: i32, %arg2: i32) -> (i32, i32, i32, i32) {
    %c0_i32 = arith.constant 0 : i32
    %c0_i32_0 = arith.constant 0 : i32
    %c0_i32_1 = arith.constant 0 : i32
    return %arg0, %arg2, %c0_i32, %c0_i32_0 : i32, i32, i32, i32
  }
  func.func @transform_4(%arg0: i32, %arg1: i32, %arg2: i32) -> (i32, i32, i32) {
    %c0_i32 = arith.constant 0 : i32
    %c0_i32_0 = arith.constant 0 : i32
    %c0_i32_1 = arith.constant 0 : i32
    return %arg2, %c0_i32, %c0_i32_0 : i32, i32, i32
  }
  func.func @transform_5(%arg0: i32, %arg1: i32, %arg2: i32) -> (i32, i32) {
    %c0_i32 = arith.constant 0 : i32
    %c0_i32_0 = arith.constant 0 : i32
    %c0_i32_1 = arith.constant 0 : i32
    return %c0_i32, %c0_i32_0 : i32, i32
  }
  func.func @transform_6(%arg0: i32, %arg1: i32, %arg2: i32) -> (i32, i32, i32) {
    %c0_i32 = arith.constant 0 : i32
    %c0_i32_0 = arith.constant 0 : i32
    return %arg0, %arg1, %c0_i32 : i32, i32, i32
  }
}

module attributes {stable_mosaic.version = 11 : i64} {
  func.func @_post_ln_kernel(%arg0: i32, %arg1: i32, %arg2: memref<1x16x32xf32, #tpu.memory_space<vmem>>, %arg3: memref<1x32xf32, #tpu.memory_space<vmem>>, %arg4: memref<1x32xf32, #tpu.memory_space<vmem>>, %arg5: memref<1x16x32xf32, #tpu.memory_space<vmem>>) attributes {dimension_semantics = [#tpu.dimension_semantics<parallel>, #tpu.dimension_semantics<parallel>], iteration_bounds = array<i64: 2, 1>, scalar_prefetch = 0 : i64, scratch_operands = 0 : i64, tpu.core_type = #tpu.core_type<tc>, window_params = [{transform_indices = @transform_0, window_bounds = array<i64: 1, 16, 32>}, {pipeline_mode = #tpu.pipeline_mode<synchronous>, transform_indices = @transform_1, window_bounds = array<i64: 1, 32>}, {pipeline_mode = #tpu.pipeline_mode<synchronous>, transform_indices = @transform_2, window_bounds = array<i64: 1, 32>}, {transform_indices = @transform_3, window_bounds = array<i64: 1, 16, 32>}]} {
    %c0 = arith.constant 0 : index
    %c0_0 = arith.constant 0 : index
    %c0_1 = arith.constant 0 : index
    %0 = vector.load %arg2[%c0, %c0_0, %c0_1] : memref<1x16x32xf32, #tpu.memory_space<vmem>>, vector<1x16x32xf32>
    %1 = vector.shape_cast %0 : vector<1x16x32xf32> to vector<16x32xf32>
    %c0_2 = arith.constant 0 : index
    %c0_3 = arith.constant 0 : index
    %2 = vector.load %arg3[%c0_2, %c0_3] : memref<1x32xf32, #tpu.memory_space<vmem>>, vector<1x32xf32>
    %c0_4 = arith.constant 0 : index
    %c0_5 = arith.constant 0 : index
    %3 = vector.load %arg4[%c0_4, %c0_5] : memref<1x32xf32, #tpu.memory_space<vmem>>, vector<1x32xf32>
    %cst = arith.constant dense<0.000000e+00> : vector<16xf32>
    %4 = vector.multi_reduction <add>, %1, %cst [1] : vector<16x32xf32> to vector<16xf32>
    %5 = vector.shape_cast %4 : vector<16xf32> to vector<16x1xf32>
    %cst_6 = arith.constant 3.200000e+01 : f32
    %6 = vector.broadcast %cst_6 : f32 to vector<16x1xf32>
    %7 = arith.divf %5, %6 : vector<16x1xf32>
    %8 = vector.broadcast %7 : vector<16x1xf32> to vector<16x32xf32>
    %9 = arith.subf %1, %8 : vector<16x32xf32>
    %10 = arith.mulf %9, %9 : vector<16x32xf32>
    %cst_7 = arith.constant dense<0.000000e+00> : vector<16xf32>
    %11 = vector.multi_reduction <add>, %10, %cst_7 [1] : vector<16x32xf32> to vector<16xf32>
    %12 = vector.shape_cast %11 : vector<16xf32> to vector<16x1xf32>
    %cst_8 = arith.constant 3.200000e+01 : f32
    %13 = vector.broadcast %cst_8 : f32 to vector<16x1xf32>
    %14 = arith.divf %12, %13 : vector<16x1xf32>
    %15 = vector.broadcast %7 : vector<16x1xf32> to vector<16x32xf32>
    %16 = arith.subf %1, %15 : vector<16x32xf32>
    %cst_9 = arith.constant 9.99999997E-7 : f32
    %17 = vector.broadcast %cst_9 : f32 to vector<16x1xf32>
    %18 = arith.addf %14, %17 : vector<16x1xf32>
    %19 = math.rsqrt %18 : vector<16x1xf32>
    %20 = vector.broadcast %19 : vector<16x1xf32> to vector<16x32xf32>
    %21 = arith.mulf %16, %20 : vector<16x32xf32>
    %22 = vector.broadcast %2 : vector<1x32xf32> to vector<16x32xf32>
    %23 = arith.mulf %21, %22 : vector<16x32xf32>
    %24 = vector.broadcast %3 : vector<1x32xf32> to vector<16x32xf32>
    %25 = arith.addf %23, %24 : vector<16x32xf32>
    %c0_10 = arith.constant 0 : index
    %c0_11 = arith.constant 0 : index
    %c0_12 = arith.constant 0 : index
    %26 = vector.load %arg5[%c0_10, %c0_11, %c0_12] : memref<1x16x32xf32, #tpu.memory_space<vmem>>, vector<1x16x32xf32>
    %27 = vector.shape_cast %26 : vector<1x16x32xf32> to vector<16x32xf32>
    %28 = vector.shape_cast %25 : vector<16x32xf32> to vector<1x16x32xf32>
    tpu.vector_store %arg5[%c0_10, %c0_11, %c0_12], %28 {strides = array<i32>} : memref<1x16x32xf32, #tpu.memory_space<vmem>>, vector<1x16x32xf32>,
    return
  }
  func.func @transform_0(%arg0: i32, %arg1: i32) -> (i32, i32, i32) {
    %c0_i32 = arith.constant 0 : i32
    %c0_i32_0 = arith.constant 0 : i32
    return %arg0, %arg1, %c0_i32 : i32, i32, i32
  }
  func.func @transform_1(%arg0: i32, %arg1: i32) -> (i32, i32) {
    %c0_i32 = arith.constant 0 : i32
    %c0_i32_0 = arith.constant 0 : i32
    %c0_i32_1 = arith.constant 0 : i32
    return %c0_i32, %c0_i32_0 : i32, i32
  }
  func.func @transform_2(%arg0: i32, %arg1: i32) -> (i32, i32) {
    %c0_i32 = arith.constant 0 : i32
    %c0_i32_0 = arith.constant 0 : i32
    %c0_i32_1 = arith.constant 0 : i32
    return %c0_i32, %c0_i32_0 : i32, i32
  }
  func.func @transform_3(%arg0: i32, %arg1: i32) -> (i32, i32, i32) {
    %c0_i32 = arith.constant 0 : i32
    %c0_i32_0 = arith.constant 0 : i32
    return %arg0, %arg1, %c0_i32 : i32, i32, i32
  }
}

module attributes {stable_mosaic.version = 11 : i64} {
  func.func @_mlp_kernel(%arg0: i32, %arg1: i32, %arg2: i32, %arg3: memref<1x16x32xf32, #tpu.memory_space<vmem>>, %arg4: memref<1x32xf32, #tpu.memory_space<vmem>>, %arg5: memref<1x32xf32, #tpu.memory_space<vmem>>, %arg6: memref<32x64xbf16, #tpu.memory_space<vmem>>, %arg7: memref<1x64xbf16, #tpu.memory_space<vmem>>, %arg8: memref<64x32xbf16, #tpu.memory_space<vmem>>, %arg9: memref<1x32xbf16, #tpu.memory_space<vmem>>, %arg10: memref<1x16x32xf32, #tpu.memory_space<vmem>>, %arg11: memref<16x32xbf16, #tpu.memory_space<vmem>>) attributes {dimension_semantics = [#tpu.dimension_semantics<parallel>, #tpu.dimension_semantics<parallel>, #tpu.dimension_semantics<arbitrary>], iteration_bounds = array<i64: 2, 1, 1>, scalar_prefetch = 0 : i64, scratch_operands = 1 : i64, tpu.core_type = #tpu.core_type<tc>, window_params = [{transform_indices = @transform_0, window_bounds = array<i64: 1, 16, 32>}, {pipeline_mode = #tpu.pipeline_mode<synchronous>, transform_indices = @transform_1, window_bounds = array<i64: 1, 32>}, {pipeline_mode = #tpu.pipeline_mode<synchronous>, transform_indices = @transform_2, window_bounds = array<i64: 1, 32>}, {transform_indices = @transform_3, window_bounds = array<i64: 32, 64>}, {transform_indices = @transform_4, window_bounds = array<i64: 1, 64>}, {transform_indices = @transform_5, window_bounds = array<i64: 64, 32>}, {pipeline_mode = #tpu.pipeline_mode<synchronous>, transform_indices = @transform_6, window_bounds = array<i64: 1, 32>}, {transform_indices = @transform_7, window_bounds = array<i64: 1, 16, 32>}]} {
    %c0_i32 = arith.constant 0 : i32
    %0 = arith.cmpi eq, %arg2, %c0_i32 : i32
    %1 = arith.extui %0 : i1 to i32
    %c0_i32_0 = arith.constant 0 : i32
    %2 = arith.cmpi ne, %1, %c0_i32_0 : i32
    scf.if %2 {
      %c0_19 = arith.constant 0 : index
      %c0_20 = arith.constant 0 : index
      %c0_21 = arith.constant 0 : index
      %32 = vector.load %arg3[%c0_19, %c0_20, %c0_21] : memref<1x16x32xf32, #tpu.memory_space<vmem>>, vector<1x16x32xf32>
      %33 = vector.shape_cast %32 : vector<1x16x32xf32> to vector<16x32xf32>
      %c0_22 = arith.constant 0 : index
      %c0_23 = arith.constant 0 : index
      %34 = vector.load %arg4[%c0_22, %c0_23] : memref<1x32xf32, #tpu.memory_space<vmem>>, vector<1x32xf32>
      %c0_24 = arith.constant 0 : index
      %c0_25 = arith.constant 0 : index
      %35 = vector.load %arg5[%c0_24, %c0_25] : memref<1x32xf32, #tpu.memory_space<vmem>>, vector<1x32xf32>
      %cst_26 = arith.constant dense<0.000000e+00> : vector<16xf32>
      %36 = vector.multi_reduction <add>, %33, %cst_26 [1] : vector<16x32xf32> to vector<16xf32>
      %37 = vector.shape_cast %36 : vector<16xf32> to vector<16x1xf32>
      %cst_27 = arith.constant 3.200000e+01 : f32
      %38 = vector.broadcast %cst_27 : f32 to vector<16x1xf32>
      %39 = arith.divf %37, %38 : vector<16x1xf32>
      %40 = vector.broadcast %39 : vector<16x1xf32> to vector<16x32xf32>
      %41 = arith.subf %33, %40 : vector<16x32xf32>
      %42 = arith.mulf %41, %41 : vector<16x32xf32>
      %cst_28 = arith.constant dense<0.000000e+00> : vector<16xf32>
      %43 = vector.multi_reduction <add>, %42, %cst_28 [1] : vector<16x32xf32> to vector<16xf32>
      %44 = vector.shape_cast %43 : vector<16xf32> to vector<16x1xf32>
      %cst_29 = arith.constant 3.200000e+01 : f32
      %45 = vector.broadcast %cst_29 : f32 to vector<16x1xf32>
      %46 = arith.divf %44, %45 : vector<16x1xf32>
      %47 = vector.broadcast %39 : vector<16x1xf32> to vector<16x32xf32>
      %48 = arith.subf %33, %47 : vector<16x32xf32>
      %cst_30 = arith.constant 9.99999997E-7 : f32
      %49 = vector.broadcast %cst_30 : f32 to vector<16x1xf32>
      %50 = arith.addf %46, %49 : vector<16x1xf32>
      %51 = math.rsqrt %50 : vector<16x1xf32>
      %52 = vector.broadcast %51 : vector<16x1xf32> to vector<16x32xf32>
      %53 = arith.mulf %48, %52 : vector<16x32xf32>
      %54 = vector.broadcast %34 : vector<1x32xf32> to vector<16x32xf32>
      %55 = arith.mulf %53, %54 : vector<16x32xf32>
      %56 = vector.broadcast %35 : vector<1x32xf32> to vector<16x32xf32>
      %57 = arith.addf %55, %56 : vector<16x32xf32>
      %58 = arith.truncf %57 : vector<16x32xf32> to vector<16x32xbf16>
      %c0_31 = arith.constant 0 : index
      %c0_32 = arith.constant 0 : index
      %59 = vector.load %arg11[%c0_31, %c0_32] : memref<16x32xbf16, #tpu.memory_space<vmem>>, vector<16x32xbf16>
      tpu.vector_store %arg11[%c0_31, %c0_32], %58 {strides = array<i32>} : memref<16x32xbf16, #tpu.memory_space<vmem>>, vector<16x32xbf16>,
      %c0_33 = arith.constant 0 : index
      %c0_34 = arith.constant 0 : index
      %60 = vector.load %arg9[%c0_33, %c0_34] : memref<1x32xbf16, #tpu.memory_space<vmem>>, vector<1x32xbf16>
      %61 = arith.extf %60 : vector<1x32xbf16> to vector<1x32xf32>
      %62 = vector.broadcast %61 : vector<1x32xf32> to vector<16x32xf32>
      %63 = arith.addf %33, %62 : vector<16x32xf32>
      %c0_35 = arith.constant 0 : index
      %c0_36 = arith.constant 0 : index
      %c0_37 = arith.constant 0 : index
      %64 = vector.load %arg10[%c0_35, %c0_36, %c0_37] : memref<1x16x32xf32, #tpu.memory_space<vmem>>, vector<1x16x32xf32>
      %65 = vector.shape_cast %64 : vector<1x16x32xf32> to vector<16x32xf32>
      %66 = vector.shape_cast %63 : vector<16x32xf32> to vector<1x16x32xf32>
      tpu.vector_store %arg10[%c0_35, %c0_36, %c0_37], %66 {strides = array<i32>} : memref<1x16x32xf32, #tpu.memory_space<vmem>>, vector<1x16x32xf32>,
    } else {
    }
    %c0 = arith.constant 0 : index
    %c0_1 = arith.constant 0 : index
    %3 = vector.load %arg11[%c0, %c0_1] : memref<16x32xbf16, #tpu.memory_space<vmem>>, vector<16x32xbf16>
    %c0_2 = arith.constant 0 : index
    %c0_3 = arith.constant 0 : index
    %4 = vector.load %arg6[%c0_2, %c0_3] : memref<32x64xbf16, #tpu.memory_space<vmem>>, vector<32x64xbf16>
    %cst = arith.constant dense<0.000000e+00> : vector<16x64xf32>
    %5 = tpu.matmul %3, %4, %cst {dimension_numbers = #tpu.dot_dimension_numbers<[1], [0], [0], [1], [0, 0, 1, 1], [], []>} : vector<16x32xbf16>, vector<32x64xbf16>, vector<16x64xf32> -> vector<16x64xf32>
    %c0_4 = arith.constant 0 : index
    %c0_5 = arith.constant 0 : index
    %6 = vector.load %arg7[%c0_4, %c0_5] : memref<1x64xbf16, #tpu.memory_space<vmem>>, vector<1x64xbf16>
    %7 = arith.extf %6 : vector<1x64xbf16> to vector<1x64xf32>
    %8 = vector.broadcast %7 : vector<1x64xf32> to vector<16x64xf32>
    %9 = arith.addf %5, %8 : vector<16x64xf32>
    %cst_6 = arith.constant 5.000000e-01 : f32
    %10 = vector.broadcast %cst_6 : f32 to vector<16x64xf32>
    %11 = arith.mulf %10, %9 : vector<16x64xf32>
    %cst_7 = arith.constant 4.471500e-02 : f32
    %12 = vector.broadcast %cst_7 : f32 to vector<16x64xf32>
    %13 = arith.mulf %12, %9 : vector<16x64xf32>
    %14 = arith.mulf %13, %9 : vector<16x64xf32>
    %15 = arith.mulf %14, %9 : vector<16x64xf32>
    %16 = arith.addf %9, %15 : vector<16x64xf32>
    %cst_8 = arith.constant 0.797884583 : f32
    %17 = vector.broadcast %cst_8 : f32 to vector<16x64xf32>
    %18 = arith.mulf %17, %16 : vector<16x64xf32>
    %19 = math.tanh %18 : vector<16x64xf32>
    %cst_9 = arith.constant 1.000000e+00 : f32
    %20 = vector.broadcast %cst_9 : f32 to vector<16x64xf32>
    %21 = arith.addf %20, %19 : vector<16x64xf32>
    %22 = arith.mulf %11, %21 : vector<16x64xf32>
    %c0_10 = arith.constant 0 : index
    %c0_11 = arith.constant 0 : index
    %c0_12 = arith.constant 0 : index
    %23 = vector.load %arg10[%c0_10, %c0_11, %c0_12] : memref<1x16x32xf32, #tpu.memory_space<vmem>>, vector<1x16x32xf32>
    %24 = vector.shape_cast %23 : vector<1x16x32xf32> to vector<16x32xf32>
    %25 = arith.truncf %22 : vector<16x64xf32> to vector<16x64xbf16>
    %c0_13 = arith.constant 0 : index
    %c0_14 = arith.constant 0 : index
    %26 = vector.load %arg8[%c0_13, %c0_14] : memref<64x32xbf16, #tpu.memory_space<vmem>>, vector<64x32xbf16>
    %cst_15 = arith.constant dense<0.000000e+00> : vector<16x32xf32>
    %27 = tpu.matmul %25, %26, %cst_15 {dimension_numbers = #tpu.dot_dimension_numbers<[1], [0], [0], [1], [0, 0, 1, 1], [], []>} : vector<16x64xbf16>, vector<64x32xbf16>, vector<16x32xf32> -> vector<16x32xf32>
    %28 = arith.addf %24, %27 : vector<16x32xf32>
    %c0_16 = arith.constant 0 : index
    %c0_17 = arith.constant 0 : index
    %c0_18 = arith.constant 0 : index
    %29 = vector.load %arg10[%c0_16, %c0_17, %c0_18] : memref<1x16x32xf32, #tpu.memory_space<vmem>>, vector<1x16x32xf32>
    %30 = vector.shape_cast %29 : vector<1x16x32xf32> to vector<16x32xf32>
    %31 = vector.shape_cast %28 : vector<16x32xf32> to vector<1x16x32xf32>
    tpu.vector_store %arg10[%c0_16, %c0_17, %c0_18], %31 {strides = array<i32>} : memref<1x16x32xf32, #tpu.memory_space<vmem>>, vector<1x16x32xf32>,
    return
  }
  func.func @transform_0(%arg0: i32, %arg1: i32, %arg2: i32) -> (i32, i32, i32) {
    %c0_i32 = arith.constant 0 : i32
    %c0_i32_0 = arith.constant 0 : i32
    return %arg0, %arg1, %c0_i32 : i32, i32, i32
  }
  func.func @transform_1(%arg0: i32, %arg1: i32, %arg2: i32) -> (i32, i32) {
    %c0_i32 = arith.constant 0 : i32
    %c0_i32_0 = arith.constant 0 : i32
    %c0_i32_1 = arith.constant 0 : i32
    return %c0_i32, %c0_i32_0 : i32, i32
  }
  func.func @transform_2(%arg0: i32, %arg1: i32, %arg2: i32) -> (i32, i32) {
    %c0_i32 = arith.constant 0 : i32
    %c0_i32_0 = arith.constant 0 : i32
    %c0_i32_1 = arith.constant 0 : i32
    return %c0_i32, %c0_i32_0 : i32, i32
  }
  func.func @transform_3(%arg0: i32, %arg1: i32, %arg2: i32) -> (i32, i32) {
    %c0_i32 = arith.constant 0 : i32
    %c0_i32_0 = arith.constant 0 : i32
    return %c0_i32, %arg2 : i32, i32
  }
  func.func @transform_4(%arg0: i32, %arg1: i32, %arg2: i32) -> (i32, i32) {
    %c0_i32 = arith.constant 0 : i32
    %c0_i32_0 = arith.constant 0 : i32
    return %c0_i32, %arg2 : i32, i32
  }
  func.func @transform_5(%arg0: i32, %arg1: i32, %arg2: i32) -> (i32, i32) {
    %c0_i32 = arith.constant 0 : i32
    %c0_i32_0 = arith.constant 0 : i32
    return %arg2, %c0_i32 : i32, i32
  }
  func.func @transform_6(%arg0: i32, %arg1: i32, %arg2: i32) -> (i32, i32) {
    %c0_i32 = arith.constant 0 : i32
    %c0_i32_0 = arith.constant 0 : i32
    %c0_i32_1 = arith.constant 0 : i32
    return %c0_i32, %c0_i32_0 : i32, i32
  }
  func.func @transform_7(%arg0: i32, %arg1: i32, %arg2: i32) -> (i32, i32, i32) {
    %c0_i32 = arith.constant 0 : i32
    %c0_i32_0 = arith.constant 0 : i32
    return %arg0, %arg1, %c0_i32 : i32, i32, i32
  }
}

</mosaic_0001>

<bundles_post_ra>
// kernel: siglip_vision_forward.8
= control target key start
LH: loop header
LB: loop body
LE: loop exit
PB: predicated region body
PF: predicated region fallthrough
CT: control target
= control target key end

     0   :  { %s703_s15 = smov 0   ;;  %s705_s16 = smov 0   ;;  %s794_s0 = inlined_call_operand.vmem [shape: f32[2,16,256], index: 0, kind: input, shape index: {}]   ;;  %s795_s1 = inlined_call_operand.vmem [shape: bf16[256,32], index: 1, kind: input, shape index: {}]   ;;  %s796_s2 = inlined_call_operand.vmem [shape: bf16[1,32], index: 2, kind: input, shape index: {}]   ;;  %s797_s3 = inlined_call_operand.vmem [shape: bf16[16,32], index: 3, kind: input, shape index: {}]   ;;  %s798_s4 = inlined_call_operand.vmem [shape: f32[2,16,32], index: 4, kind: output, shape index: {}]  }
   0x1   :  { %s707_s17 = smov 0  }
   0x2 LB: > { %s26_s18 = sadd.s32 1, %s672_s16  ;;  %p563_p0 = scmp.ge.s32.totalorder %s676_s17, 1  ;;  %s676_s17 = sphi %s707_s17, %s14_s17   ;;  %s672_s16 = sphi %s705_s16, %s800_s16   ;;  %s668_s15 = sphi %s703_s15, %s799_s15  }
   0x3   : > { %p28_p1 = scmp.ge.s32.totalorder %s26_s18, 2  ;;  %p195_p2 = scmp.lt.s32.totalorder %s676_s17, 3 }
   0x5   : > { %s802_s18 = smov (%p28_p1, %s26_s18), 0  ;;  %p196_p3 = pnand %p563_p0, %p195_p2 }
   0x6   : > { %p236_p4 = scmp.lt.s32.totalorder (!%p196_p3), %s668_s15, 1 }
   0x7   : > { %199 = sbr.rel (%p196_p3) target bundleno = 251 (0xfb), region = 36 }
   0xc   : > { %v638_v0 = vld [vmem:[%s795_s1 + $0x78] sm:$0xff]   ;;  %v640_v2 = vld [vmem:[%s795_s1 + $0x70] sm:$0xff]   ;;  %v642_v4 = vld [vmem:[%s795_s1 + $0x68] sm:$0xff]   ;;  %s804_s15 = smov (!%p236_p4, %s668_s15), 1  ;;  %v303_v22 = vlaneseq  ;;  %vm450_vm0 = vcmask 261120  }
   0xd   : > { %v639_v1 = vld [vmem:[%s795_s1 + $0x38] sm:$0xff]   ;;  %592 = vmatprep.subr.bf16.mxu0 %v638_v0  ;;  %v641_v3 = vld [vmem:[%s795_s1 + $0x30] sm:$0xff]   ;;  %v643_v5 = vld [vmem:[%s795_s1 + $0x28] sm:$0xff]   ;;  %s586_s7 = sshll.u32 %s804_s15, 5  ;;  %s587_s11 = sshll.u32 %s804_s15, 4 }
   0xe   : > { %593 = vmatpush3.bf16.msra.mxu0 %v639_v1  ;;  %v644_v6 = vld [vmem:[%s795_s1 + $0x60] sm:$0xff]   ;;  %v646_v8 = vld [vmem:[%s795_s1 + $0x58] sm:$0xff]   ;;  %s244_s14 = scalar_lea.vmem %s794_s0, %s586_s7  ;;  %v648_v10 = vld [vmem:[%s795_s1 + $0x50] sm:$0xff]   ;;  %v304_v23 = vshrl.u32 %v303_v22, 7 }
   0xf   : > { %594 = vmatprep.subr.bf16.mxu0 %v640_v2  ;;  %v645_v7 = vld [vmem:[%s795_s1 + $0x20] sm:$0xff]   ;;  %v647_v9 = vld [vmem:[%s795_s1 + $0x18] sm:$0xff]   ;;  %v264_v11 = vld [vmem:[%s244_s14 + $0x8] sm:$0xff] }
  0x10   : > { %v266_v12 = vld [vmem:[%s244_s14 + $0x18] sm:$0xff]  ;;  %v649_v14 = vld [vmem:[%s795_s1 + $0x10] sm:$0xff]   ;;  %v650_v15 = vld [vmem:[%s795_s1 + $0x48] sm:$0xff]   ;;  %v305_v26 = vsub.s32 0, %v304_v23 }
  0x11   : > { %v268_v13 = vpack.c.bf16 %v266_v12, %v264_v11  ;;  %v651_v16 = vld [vmem:[%s795_s1 + $0x8] sm:$0xff]   ;;  %v652_v17 = vld [vmem:[%s795_s1 + $0x40] sm:$0xff]   ;;  %v265_v20 = vld [vmem:[%s244_s14 + $0x10] sm:$0xff] }
  0x12   : > { %595 = vmatpush3.bf16.msra.mxu0 %v641_v3  ;;  %v653_v18 = vld [vmem:[%s795_s1] sm:$0xff]  }
  0x13   : > { %596 = vmatprep.subr.bf16.mxu0 %v642_v4  ;;  %435 = vmatprep.mubr.bf16.mxu0 %v268_v13  ;;  %v263_v19 = vld [vmem:[%s244_s14] sm:$0xff]  ;;  %s260_s14 = scalar_lea.vmem %s798_s4, %s587_s11 }
  0x14   : > { %v267_v21 = vpack.c.bf16 %v265_v20, %v263_v19  ;;  %v301_v24 = vld [vmem:[%s796_s2] sm:$0x1] }
  0x15   : > { %v302_v25 = vunpack.c.l.bf16 %v301_v24  ;;  %v589_v28 = vld [vmem:[%s797_s3] sm:$0xff]  }
  0x16   : > { %597 = vmatpush3.bf16.msra.mxu0 %v643_v5  ;;  %v590_v32 = vunpack.c.l.bf16 %v589_v28  ;;  %v591_v38 = vunpack.c.h.bf16 %v589_v28 }
  0x17   : > { %598 = vmatprep.subr.bf16.mxu0 %v644_v6  ;;  %v306_v29 = vrot.slane %v302_v25, %v305_v26 }
  0x1a   : > { %599 = vmatpush3.bf16.msra.mxu0 %v645_v7 }
  0x1b   : > { %600 = vmatprep.subr.bf16.mxu0 %v646_v8 }
  0x1e   : > { %601 = vmatpush3.bf16.msra.mxu0 %v647_v9 }
  0x1f   : > { %602 = vmatprep.subr.bf16.mxu0 %v648_v10 }
  0x22   : > { %603 = vmatpush3.bf16.msra.mxu0 %v649_v14 }
  0x23   : > { %604 = vmatprep.subr.bf16.mxu0 %v650_v15 }
  0x26   : > { %605 = vmatpush3.bf16.msra.mxu0 %v651_v16 }
  0x27   : > { %606 = vmatprep.subr.bf16.mxu0 %v652_v17 }
  0x2a   : > { %607 = vmatpush3.bf16.msra.mxu0 %v653_v18 }
  0x2d   : > { %436 = vmatmul.mubr.bf16.vlgmr.msra.gmra.mxu0 %v267_v21 }
  0xed   : > { %v608_v27 = vpop.f32.mrf.mxu0 }
  0xef   : > { %v609_v30 = vpop.f32.mrf.mxu0 }
  0xf0   : > { %v610_v31 = vadd.f32 %v609_v30, %v608_v27 }
  0xf1   : > { %v611_v33 = vpop.f32.mrf.mxu0 }
  0xf2   : > { %v438_v34 = vadd.f32 %v610_v31, %v306_v29 }
  0xf3   : > { %v612_v35 = vpop.f32.mrf.mxu0 }
  0xf4   : > { %v448_v36 = vadd.f32 %v590_v32, %v438_v34  ;;  %v613_v37 = vadd.f32 %v612_v35, %v611_v33 }
  0xf6   : > { %451 = vst.msk [vmem:[%s260_s14] sm:$0xff] %vm450_vm0, %v448_v36  ;;  %v441_v39 = vadd.f32 %v613_v37, %v306_v29 }
  0xf8   : > { %v449_v40 = vadd.f32 %v591_v38, %v441_v39 }
  0xfa   : > { %452 = vst.msk [vmem:[%s260_s14 + $0x8] sm:$0xff] %vm450_vm0, %v449_v40 }
  0xfb PF: > { %s14_s17 = sadd.s32 1, %s676_s17   ;;  %s799_s15 = smov %s672_s16 }
  0xfc   : > { %p11_p5 = scmp.ge.s32.totalorder %s14_s17, 4   ;;  %s800_s16 = smov %s802_s18 }
  0xfe   :  { %13 = sbr.rel (!%p11_p5) target bundleno = 2 (0x2), region = 69 }

// kernel: siglip_vision_forward.9
= control target key start
LH: loop header
LB: loop body
LE: loop exit
PB: predicated region body
PF: predicated region fallthrough
CT: control target
= control target key end

     0   :  { %s1130_s17 = smov 0   ;;  %s1132_s18 = smov 0   ;;  %s1222_s0 = inlined_call_operand.vmem [shape: f32[2,16,32], index: 0, kind: input, shape index: {}]   ;;  %s1223_s1 = inlined_call_operand.vmem [shape: f32[1,32], index: 1, kind: input, shape index: {}]   ;;  %s1224_s2 = inlined_call_operand.vmem [shape: f32[1,32], index: 2, kind: input, shape index: {}]   ;;  %s1225_s3 = inlined_call_operand.vmem [shape: bf16[32,32], index: 3, kind: input, shape index: {}]   ;;  %s1226_s4 = inlined_call_operand.vmem [shape: bf16[1,32], index: 4, kind: input, shape index: {}]   ;;  %s1227_s5 = inlined_call_operand.vmem [shape: bf16[32,32], index: 5, kind: input, shape index: {}]   ;;  %s1228_s6 = inlined_call_operand.vmem [shape: bf16[1,32], index: 6, kind: input, shape index: {}]   ;;  %s1229_s7 = inlined_call_operand.vmem [shape: bf16[32,32], index: 7, kind: input, shape index: {}]   ;;  %s1230_s8 = inlined_call_operand.vmem [shape: bf16[1,32], index: 8, kind: input, shape index: {}]   ;;  %s1231_s9 = inlined_call_operand.vmem [shape: bf16[2,16,32], index: 9, kind: output, shape index: {0}]   ;;  %s1232_s10 = inlined_call_operand.vmem [shape: bf16[2,16,32], index: 10, kind: output, shape index: {1}]   ;;  %s1233_s11 = inlined_call_operand.vmem [shape: bf16[2,16,32], index: 11, kind: output, shape index: {2}]  }
   0x1   :  { %s1134_s19 = smov 0  }
   0x2 LB: > { %s34_s20 = sadd.s32 1, %s1062_s18  ;;  %p937_p0 = scmp.ge.s32.totalorder %s1066_s19, 1  ;;  %s1066_s19 = sphi %s1134_s19, %s22_s19   ;;  %s1062_s18 = sphi %s1132_s18, %s1235_s18   ;;  %s1058_s17 = sphi %s1130_s17, %s1234_s17  }
   0x3   : > { %p36_p1 = scmp.ge.s32.totalorder %s34_s20, 2  ;;  %p367_p2 = scmp.lt.s32.totalorder %s1066_s19, 3 }
   0x5   : > { %s1237_s20 = smov (%p36_p1, %s34_s20), 0  ;;  %p368_p3 = pnand %p937_p0, %p367_p2 }
   0x6   : > { %p434_p4 = scmp.lt.s32.totalorder (!%p368_p3), %s1058_s17, 1 }
   0x7   : > { %371 = sbr.rel (%p368_p3) target bundleno = 540 (0x21c), region = 56 }
   0xc   : > { %s1239_s17 = smov (!%p434_p4, %s1058_s17), 1  ;;  %vm478_vm0 = vcmask 261120   ;;  %v1034_v14 = vld [vmem:[%s1225_s3 + $0x8] sm:$0xff]   ;;  %v1068_v16 = vmov 0.0   ;;  %v1036_v17 = vld [vmem:[%s1225_s3] sm:$0xff]   ;;  %vm1069_vm1 = vmmov 0   ;;  %v529_v38 = vlaneseq }
   0xd   : > { %s965_s21 = sshll.u32 %s1239_s17, 4  ;;  %v1035_v15 = vld [vmem:[%s1227_s5 + $0x8] sm:$0xff]   ;;  %984 = vmatprep.subr.bf16.mxu0 %v1068_v16  ;;  %992 = vmatprep.subr.bf16.mxu1 %v1068_v16  ;;  %v1037_v18 = vld [vmem:[%s1227_s5] sm:$0xff]   ;;  %s966_s13 = sshll.u32 %s1239_s17, 3  ;;  %vm597_vm2 = vcmask 257024  }
   0xe   : > { %s441_s24 = scalar_lea.vmem %s1222_s0, %s965_s21  ;;  %985 = vmatpush3.bf16.msra.mxu0 %v1034_v14  ;;  %993 = vmatpush3.bf16.msra.mxu1 %v1035_v15  ;;  %v946_v27 = vld [vmem:[%s1223_s1] ss:$0 sm:$0xff]  ;;  %v1038_v35 = vld [vmem:[%s1229_s7 + $0x8] sm:$0xff]   ;;  %v530_v39 = vshrl.u32 %v529_v38, 7  ;;  %s451_s16 = scalar_lea.vmem %s1231_s9, %s966_s13 }
   0xf   : > { %v474_v0 = vld [vmem:[%s441_s24] sm:$0xff]  ;;  %v475_v1 = vld [vmem:[%s441_s24 + $0x8] sm:$0xff]  ;;  %986 = vmatprep.subr.bf16.mxu0 %v1068_v16  ;;  %994 = vmatprep.subr.bf16.mxu1 %v1068_v16  ;;  %s461_s23 = scalar_lea.vmem %s1232_s10, %s966_s13  ;;  %s471_s25 = scalar_lea.vmem %s1233_s11, %s966_s13 }
  0x10   : > { %v479_v2 = vsel %vm478_vm0, %v474_v0, 0.0  ;;  %v482_v3 = vsel %vm478_vm0, %v475_v1, 0.0  ;;  %988 = vmatprep.mubr.msk.bf16.mxu0 %vm1069_vm1, %v1068_v16  ;;  %996 = vmatprep.mubr.msk.bf16.mxu1 %vm1069_vm1, %v1068_v16  ;;  %v947_v31 = vld [vmem:[%s1224_s2] ss:$0 sm:$0xff]  ;;  %v531_v43 = vsub.s32 0, %v530_v39 }
  0x11   : > { %480 = vadd.xlane.f32.xlu0 %v479_v2  ;;  %v1039_v37 = vld [vmem:[%s1229_s7] sm:$0xff]  }
  0x12   : > { %987 = vmatpush3.bf16.msra.mxu0 %v1036_v17  ;;  %995 = vmatpush3.bf16.msra.mxu1 %v1037_v18  ;;  %v527_v40 = vld [vmem:[%s1226_s4] sm:$0x1] }
  0x13   : > { %1000 = vmatprep.subr.bf16.mxu0 %v1068_v16  ;;  %v604_v41 = vld [vmem:[%s1228_s6] sm:$0x1]  ;;  %v528_v42 = vunpack.c.l.bf16 %v527_v40 }
  0x14   : > { %v605_v44 = vunpack.c.l.bf16 %v604_v41  ;;  %v677_v47 = vld [vmem:[%s1230_s8] sm:$0x1] }
  0x15   : > { %483 = vadd.xlane.f32.xlu0 %v482_v3  ;;  %v532_v45 = vrot.slane %v528_v42, %v531_v43  ;;  %v678_v52 = vunpack.c.l.bf16 %v677_v47 }
  0x16   : > { %v609_v46 = vrot.slane %v605_v44, %v531_v43 }
  0x17   : > { %v682_v61 = vrot.slane %v678_v52, %v531_v43 }
  0x9a   : > { %v481_v4 = vpop.xlane.xlu0 %480 }
  0x9b   : > { %v486_v5 = vmul.f32 0.03125, %v481_v4 }
  0x9d   : > { %v488_v6 = vsub.f32 %v474_v0, %v486_v5 }
  0x9e   : > { %v484_v7 = vpop.xlane.xlu0 %483 }
  0x9f   : > { %v487_v8 = vmul.f32 0.03125, %v484_v7  ;;  %v490_v9 = vmul.f32 %v488_v6, %v488_v6 }
  0xa1   : > { %v489_v10 = vsub.f32 %v475_v1, %v487_v8  ;;  %v492_v11 = vsel %vm478_vm0, %v490_v9, 0.0 }
  0xa2   : > { %493 = vadd.xlane.f32.xlu1 %v492_v11 }
  0xa3   : > { %v491_v12 = vmul.f32 %v489_v10, %v489_v10 }
  0xa5   : > { %v495_v13 = vsel %vm478_vm0, %v491_v12, 0.0 }
  0xa6   : > { %496 = vadd.xlane.f32.xlu1 %v495_v13 }
 0x12b   : > { %v494_v19 = vpop.xlane.xlu1 %493 }
 0x12c   : > { %v498_v20 = vmul.f32 0.03125, %v494_v19 }
 0x12e   : > { %v500_v21 = vadd.f32 1e-06, %v498_v20 }
 0x12f   : > { %v497_v22 = vpop.xlane.xlu1 %496 }
 0x130   : > { %1040 = vrsqrt.f32 %v500_v21  ;;  %v499_v23 = vmul.f32 0.03125, %v497_v22 }
 0x132   : > { %v501_v24 = vadd.f32 1e-06, %v499_v23 }
 0x134   : > { %1042 = vrsqrt.f32 %v501_v24 }
 0x13d   : > { %v1041_v25 = vpop.eup %1040 }
 0x13e   : > { %v504_v26 = vmul.f32 %v1041_v25, %v488_v6 }
 0x140   : > { %v512_v30 = vmul.f32 %v946_v27, %v504_v26 }
 0x141   : > { %v1043_v28 = vpop.eup %1042 }
 0x142   : > { %v505_v29 = vmul.f32 %v1043_v28, %v489_v10  ;;  %v520_v33 = vadd.f32 %v947_v31, %v512_v30 }
 0x144   : > { %v513_v32 = vmul.f32 %v946_v27, %v505_v29 }
 0x146   : > { %v521_v34 = vadd.f32 %v947_v31, %v513_v32 }
 0x148   : > { %v522_v36 = vpack.c.bf16 %v521_v34, %v520_v33 }
 0x14a   : > { %989 = vmatmul.mubr.msk.bf16.vlgmr.msra.gmra.mxu0 %vm478_vm0, %v522_v36  ;;  %997 = vmatmul.mubr.msk.bf16.vlgmr.msra.gmra.mxu1 %vm478_vm0, %v522_v36 }
 0x14b   : > { %1001 = vmatpush3.bf16.msra.mxu0 %v1038_v35  ;;  %1004 = vmatprep.mubr.msk.bf16.mxu0 %vm1069_vm1, %v1068_v16 }
 0x14c   : > { %1002 = vmatprep.subr.bf16.mxu0 %v1068_v16 }
 0x14f   : > { %1003 = vmatpush3.bf16.msra.mxu0 %v1039_v37 }
 0x152   : > { %1005 = vmatmul.mubr.msk.bf16.vlgmr.msra.gmra.mxu0 %vm478_vm0, %v522_v36 }
 0x20a   : > { %v582_v48 = vpop.f32.mrf.mxu0  ;;  %v656_v49 = vpop.f32.mrf.mxu1 }
 0x20b   : > { %v583_v50 = vadd.f32 %v582_v48, %v532_v45  ;;  %v657_v51 = vadd.f32 %v656_v49, %v609_v46 }
 0x20c   : > { %v990_v53 = vpop.f32.mrf.mxu0  ;;  %v998_v54 = vpop.f32.mrf.mxu1 }
 0x20d   : > { %v969_v55 = vpack.c.bf16 %v583_v50, %v583_v50  ;;  %v971_v56 = vpack.c.bf16 %v657_v51, %v657_v51 }
 0x20e   : > { %v585_v57 = vpop.f32.mrf.mxu0  ;;  %v659_v58 = vpop.f32.mrf.mxu1 }
 0x20f   : > { %598 = vst.msk [vmem:[%s451_s16] sm:$0xf] %vm597_vm2, %v969_v55  ;;  %671 = vst.msk [vmem:[%s461_s23] sm:$0xf] %vm597_vm2, %v971_v56  ;;  %v586_v59 = vadd.f32 %v585_v57, %v532_v45  ;;  %v660_v60 = vadd.f32 %v659_v58, %v609_v46 }
 0x210   : > { %v991_v62 = vpop.f32.mrf.mxu0  ;;  %v999_v63 = vpop.f32.mrf.mxu1 }
 0x211   : > { %v970_v0 = vpack.c.bf16 %v586_v59, %v586_v59  ;;  %v972_v1 = vpack.c.bf16 %v660_v60, %v660_v60 }
 0x212   : > { %v729_v2 = vpop.f32.mrf.mxu0 }
 0x213   : > { %599 = vst.msk [vmem:[%s451_s16 + $0x4] sm:$0xf] %vm597_vm2, %v970_v0  ;;  %672 = vst.msk [vmem:[%s461_s23 + $0x4] sm:$0xf] %vm597_vm2, %v972_v1  ;;  %v730_v3 = vadd.f32 %v729_v2, %v682_v61 }
 0x214   : > { %v1006_v4 = vpop.f32.mrf.mxu0 }
 0x215   : > { %v973_v5 = vpack.c.bf16 %v730_v3, %v730_v3 }
 0x216   : > { %v732_v6 = vpop.f32.mrf.mxu0 }
 0x217   : > { %744 = vst.msk [vmem:[%s471_s25] sm:$0xf] %vm597_vm2, %v973_v5  ;;  %v733_v7 = vadd.f32 %v732_v6, %v682_v61 }
 0x218   : > { %v1007_v8 = vpop.f32.mrf.mxu0 }
 0x219   : > { %v974_v9 = vpack.c.bf16 %v733_v7, %v733_v7 }
 0x21b   : > { %745 = vst.msk [vmem:[%s471_s25 + $0x4] sm:$0xf] %vm597_vm2, %v974_v9 }
 0x21c PF: > { %s22_s19 = sadd.s32 1, %s1066_s19   ;;  %s1234_s17 = smov %s1062_s18 }
 0x21d   : > { %p19_p5 = scmp.ge.s32.totalorder %s22_s19, 4   ;;  %s1235_s18 = smov %s1237_s20 }
 0x21f   :  { %21 = sbr.rel (!%p19_p5) target bundleno = 2 (0x2), region = 110 }

// kernel: siglip_vision_forward.10
= control target key start
LH: loop header
LB: loop body
LE: loop exit
PB: predicated region body
PF: predicated region fallthrough
CT: control target
= control target key end

     0   :  { %s1001_s21 = smov 0   ;;  %s1003_s22 = smov 0   ;;  %s1104_s0 = inlined_call_operand.vmem [shape: f32[2,16,32], index: 0, kind: input, shape index: {}]   ;;  %s1105_s1 = inlined_call_operand.vmem [shape: bf16[2,4,16,8], index: 1, kind: input, shape index: {}]   ;;  %s1106_s2 = inlined_call_operand.vmem [shape: bf16[2,4,16,8], index: 2, kind: input, shape index: {}]   ;;  %s1107_s3 = inlined_call_operand.vmem [shape: bf16[2,4,16,8], index: 3, kind: input, shape index: {}]   ;;  %s1108_s4 = inlined_call_operand.vmem [shape: bf16[4,8,32], index: 4, kind: input, shape index: {}]   ;;  %s1109_s5 = inlined_call_operand.vmem [shape: bf16[1,32], index: 5, kind: input, shape index: {}]   ;;  %s1110_s6 = inlined_call_operand.vmem [shape: f32[2,16,32], index: 6, kind: output, shape index: {}]  }
   0x1   :  { %s1005_s23 = smov 0   ;;  %s1007_s24 = smov 0  }
   0x2   :  { %s1009_s25 = smov 0  }
   0x3 LB: > { %s28_s26 = sadd.s32 1, %s954_s23  ;;  %s35_s27 = sadd.s32 1, %s958_s24  ;;  %s962_s25 = sphi %s1009_s25, %s16_s25   ;;  %s958_s24 = sphi %s1007_s24, %s1114_s24   ;;  %s954_s23 = sphi %s1005_s23, %s1113_s23   ;;  %s950_s22 = sphi %s1003_s22, %s1112_s22   ;;  %s946_s21 = sphi %s1001_s21, %s1111_s21  }
   0x4   : > { %p29_p0 = scmp.ge.s32.totalorder %s28_s26, 4  ;;  %p821_p1 = scmp.ge.s32.totalorder %s962_s25, 1 }
   0x5   : > { %p304_p2 = scmp.lt.s32.totalorder %s962_s25, 9 }
   0x6   : > { %s1116_s26 = smov (%p29_p0, %s28_s26), 0  ;;  %s1118_s27 = smov (!%p29_p0, %s35_s27), %s958_s24 }
   0x7   : > { %p305_p3 = pnand %p821_p1, %p304_p2  ;;  %p37_p4 = scmp.ge.s32.totalorder %s1118_s27, 2 }
   0x8   : > { %p378_p5 = scmp.lt.s32.totalorder (!%p305_p3), %s950_s22, 1  ;;  %p390_p6 = scmp.lt.s32.totalorder (!%p305_p3), %s946_s21, 3 }
   0x9   : > { %s1120_s27 = smov (%p37_p4, %s1118_s27), 0  ;;  %308 = sbr.rel (%p305_p3) target bundleno = 958 (0x3be), region = 44 }
   0xa   : > { %p836_p7 = scmp.ne.s32.totalorder (!%p305_p3), %s946_s21, 0 }
   0xe   : > { %s1122_s22 = smov (!%p378_p5, %s950_s22), 1 }
   0xf   : > { %s391_s28 = scalar_select %p390_p6, %s946_s21, 3 }
  0x10   : > { %s845_s29 = sshll.u32 %s1122_s22, 4  ;;  %s825_s30 = sshll.u32 %s1122_s22, 3 }
  0x11   : > { %s385_s9 = scalar_lea.vmem %s1104_s0, %s845_s29  ;;  %s824_s10 = sshll.u32 %s391_s28, 1 }
  0x12   : > { %s397_s11 = sadd.s32 %s825_s30, %s824_s10  ;;  %s833_s12 = sshll.u32 %s391_s28, 2 }
  0x13   : > { %s1038_s13 = sshll.u32 %s397_s11, 2  ;;  %s1043_s16 = scalar_lea.vmem %s1108_s4, %s833_s12 }
  0x14   : > { %s399_s19 = scalar_lea.vmem %s1105_s1, %s1038_s13  ;;  %s409_s7 = scalar_lea.vmem %s1106_s2, %s1038_s13 }
  0x15   : > { %s418_s8 = scalar_lea.vmem %s1107_s3, %s1038_s13  ;;  %s1060_s14 = scalar_lea.vmem %s1110_s6, %s845_s29 }
  0x16   : > { %437 = sbr.rel (%p836_p7) target bundleno = 38 (0x26), region = 48 }
  0x1b   : > { %v440_v0 = vld [vmem:[%s1109_s5] sm:$0x1]  ;;  %v442_v1 = vlaneseq  ;;  %v439_v6 = vld [vmem:[%s385_s9 + $0x8] sm:$0xff]  ;;  %vm448_vm0 = vcmask 261120  }
  0x1c   : > { %v441_v2 = vunpack.c.l.bf16 %v440_v0  ;;  %v438_v5 = vld [vmem:[%s385_s9] sm:$0xff] }
  0x1d   : > { %v443_v3 = vshrl.u32 %v442_v1, 7 }
  0x1f   : > { %v444_v4 = vsub.s32 0, %v443_v3 }
  0x21   : > { %v445_v7 = vrot.slane %v441_v2, %v444_v4 }
  0x23   : > { %v446_v8 = vadd.f32 %v445_v7, %v438_v5  ;;  %v447_v9 = vadd.f32 %v445_v7, %v439_v6 }
  0x25   : > { %449 = vst.msk [vmem:[%s1060_s14] sm:$0xff] %vm448_vm0, %v446_v8  ;;  %450 = vst.msk [vmem:[%s1060_s14 + $0x8] sm:$0xff] %vm448_vm0, %v447_v9 }
  0x26 PF: > { %v913_v10 = vld [vmem:[%s409_s7] sm:$0xff]   ;;  %v964_v11 = vmov 0.0   ;;  %vm467_vm1 = vcmask 64512   ;;  %vm965_vm2 = vmmov 0   ;;  %vm515_vm3 = vcmask 130048  }
  0x27   : > { %853 = vmatprep.subr.bf16.mxu0 %v964_v11  ;;  %859 = vmatprep.subr.bf16.mxu1 %v964_v11  ;;  %v472_v12 = vsel %vm467_vm1, %v913_v10, 0  ;;  %v914_v13 = vld [vmem:[%s399_s19] sm:$0xff]   ;;  %vm596_vm4 = vcmask 1043456   ;;  %vm643_vm5 = vcmask 261120  }
  0x28   : > { %855 = vmatprep.mubr.msk.bf16.mxu0 %vm965_vm2, %v964_v11  ;;  %861 = vmatprep.mubr.msk.bf16.mxu1 %vm965_vm2, %v964_v11  ;;  %v915_v30 = vld [vmem:[%s418_s8] sm:$0xff]  }
  0x29   : > { %854 = vmatpush3.bf16.xpose.msra.mxu0 %v472_v12  ;;  %860 = vmatpush3.bf16.msra.mxu1 %v915_v30  ;;  %v592_v35 = vld [vmem:[%s1043_s16] sm:$0xf] }
  0x2a   : > { %865 = vmatprep.subr.bf16.mxu1 %v964_v11  ;;  %v598_v39 = vsel %vm596_vm4, %v592_v35, 0 }
  0x2c   : > { %v589_v45 = vld [vmem:[%s1060_s14] sm:$0xff]  ;;  %v590_v49 = vld [vmem:[%s1060_s14 + $0x8] sm:$0xff] }
  0x30   : > { %856 = vmatmul.mubr.msk.bf16.vlgmr.msra.gmra.mxu0 %vm467_vm1, %v914_v13 }
  0xf0   : > { %v508_v14 = vpop.f32.mrf.mxu0 }
  0xf1   : > { %v516_v15 = vsel %vm515_vm3, %v508_v14, -inf }
  0xf2   : > { %517 = vmax.xlane.f32.xlu0 %v516_v15  ;;  %v857_v16 = vpop.f32.mrf.mxu0 }
  0xf4   : > { %v511_v17 = vpop.f32.mrf.mxu0 }
  0xf5   : > { %v519_v18 = vsel %vm515_vm3, %v511_v17, -inf }
  0xf6   : > { %520 = vmax.xlane.f32.xlu0 %v519_v18  ;;  %v858_v19 = vpop.f32.mrf.mxu0 }
 0x17b   : > { %v518_v20 = vpop.xlane.xlu0 %517 }
 0x17c   : > { %v522_v21 = vsub.f32 %v508_v14, %v518_v20 }
 0x17e   : > { %v524_v22 = vmul.f32 1.442695, %v522_v21 }
 0x17f   : > { %v521_v23 = vpop.xlane.xlu0 %520 }
 0x180   : > { %916 = vpow2.f32 %v524_v22  ;;  %v523_v24 = vsub.f32 %v511_v17, %v521_v23 }
 0x182   : > { %v526_v25 = vmul.f32 1.442695, %v523_v24 }
 0x184   : > { %918 = vpow2.f32 %v526_v25 }
 0x18d   : > { %v917_v26 = vpop.eup %916 }
 0x18e   : > { %v528_v27 = vsel %vm515_vm3, %v917_v26, 0.0 }
 0x18f   : > { %529 = vadd.xlane.f32.xlu1 %v528_v27 }
 0x191   : > { %v919_v28 = vpop.eup %918 }
 0x192   : > { %v531_v29 = vsel %vm515_vm3, %v919_v28, 0.0 }
 0x193   : > { %532 = vadd.xlane.f32.xlu1 %v531_v29 }
 0x218   : > { %v530_v31 = vpop.xlane.xlu1 %529 }
 0x219   : > { %920 = vrcp.f32 %v530_v31 }
 0x21c   : > { %v533_v32 = vpop.xlane.xlu1 %532 }
 0x21d   : > { %922 = vrcp.f32 %v533_v32 }
 0x226   : > { %v921_v33 = vpop.eup %920 }
 0x227   : > { %v536_v36 = vmul.f32 %v921_v33, %v917_v26 }
 0x22a   : > { %v923_v34 = vpop.eup %922 }
 0x22b   : > { %v537_v37 = vmul.f32 %v923_v34, %v919_v28 }
 0x22d   : > { %v538_v38 = vpack.c.bf16 %v537_v37, %v536_v36 }
 0x22f   : > { %862 = vmatmul.mubr.msk.bf16.vlgmr.msra.gmra.mxu1 %vm515_vm3, %v538_v38 }
 0x230   : > { %866 = vmatpush3.bf16.msra.mxu1 %v598_v39  ;;  %867 = vmatprep.mubr.msk.bf16.mxu1 %vm965_vm2, %v964_v11 }
 0x2ef   : > { %v582_v40 = vpop.f32.mrf.mxu1 }
 0x2f1   : > { %v863_v41 = vpop.f32.mrf.mxu1 }
 0x2f3   : > { %v585_v42 = vpop.f32.mrf.mxu1 }
 0x2f4   : > { %v591_v43 = vpack.c.bf16 %v585_v42, %v582_v40 }
 0x2f5   : > { %v864_v44 = vpop.f32.mrf.mxu1 }
 0x2f6   : > { %868 = vmatmul.mubr.msk.bf16.vlgmr.msra.gmra.mxu1 %vm467_vm1, %v591_v43 }
 0x3b6   : > { %v634_v46 = vpop.f32.mrf.mxu1 }
 0x3b7   : > { %v641_v47 = vadd.f32 %v634_v46, %v589_v45 }
 0x3b8   : > { %v869_v48 = vpop.f32.mrf.mxu1 }
 0x3b9   : > { %644 = vst.msk [vmem:[%s1060_s14] sm:$0xff] %vm643_vm5, %v641_v47 }
 0x3ba   : > { %v637_v50 = vpop.f32.mrf.mxu1 }
 0x3bb   : > { %v642_v51 = vadd.f32 %v637_v50, %v590_v49 }
 0x3bc   : > { %v870_v52 = vpop.f32.mrf.mxu1 }
 0x3bd   : > { %645 = vst.msk [vmem:[%s1060_s14 + $0x8] sm:$0xff] %vm643_vm5, %v642_v51 }
 0x3be PF: > { %s16_s25 = sadd.s32 1, %s962_s25   ;;  %s1111_s21 = smov %s954_s23 }
 0x3bf   : > { %p13_p8 = scmp.ge.s32.totalorder %s16_s25, 10   ;;  %s1112_s22 = smov %s958_s24 }
 0x3c0   : > { %s1113_s23 = smov %s1116_s26  ;;  %s1114_s24 = smov %s1120_s27 }
 0x3c1   :  { %15 = sbr.rel (!%p13_p8) target bundleno = 3 (0x3), region = 90 }

// kernel: siglip_vision_forward.15
= control target key start
LH: loop header
LB: loop body
LE: loop exit
PB: predicated region body
PF: predicated region fallthrough
CT: control target
= control target key end

     0   :  { %8 = vsyncpa [#allocation3], 0  ;;  %s650_s0 = inlined_call_operand.vmem [shape: f32[2,16,32], index: 0, kind: input, shape index: {}]   ;;  %s651_s1 = inlined_call_operand.vmem [shape: f32[1,32], index: 1, kind: input, shape index: {}]   ;;  %s652_s2 = inlined_call_operand.vmem [shape: f32[1,32], index: 2, kind: input, shape index: {}]   ;;  %s653_s3 = inlined_call_operand.hbm [shape: f32[2,16,32], index: 3, kind: output, shape index: {}]  }
   0x1   :  { %10 = vsyncpa [#allocation3 + $0x1], 0  ;;  %s524_s12 = smov 0   ;;  %s526_s13 = smov 0  }
   0x2   :  { %s528_s14 = smov 0   ;;  %s530_s15 = smov 0  }
   0x3   :  { %s532_s16 = smov 0   ;;  %s534_s17 = smov 0  }
   0x4 LB: > { %s345_s18 = sadd.s32 4294967295, %s499_s17   ;;  %s346_s19 = sadd.s32 4294967294, %s499_s17   ;;  %s499_s17 = sphi %s534_s17, %s16_s17   ;;  %s495_s16 = sphi %s532_s16, %s660_s16   ;;  %s491_s15 = sphi %s530_s15, %s659_s15   ;;  %s487_s14 = sphi %s528_s14, %s658_s14   ;;  %s483_s13 = sphi %s526_s13, %s657_s13   ;;  %s479_s12 = sphi %s524_s12, %s656_s12  }
   0x5   : > { %s28_s20 = sadd.s32 1, %s495_s16  ;;  %s107_s21 = sadd.s32 1, %s487_s14 }
   0x6   : > { %p30_p0 = scmp.ge.s32.totalorder %s28_s20, 2  ;;  %p117_p1 = scmp.ne.s32.totalorder %s487_s14, %s483_s13 }
   0x7   : > { %p118_p2 = scmp.eq.s32.totalorder %s345_s18, 1  ;;  %p123_p3 = scmp.ne.s32.totalorder %s483_s13, %s479_s12 }
   0x8   : > { %s662_s20 = smov (%p30_p0, %s28_s20), 0  ;;  %p124_p5 = scmp.eq.s32.totalorder %s346_s19, 1 }
   0x9   : > { %p564_p4 = por %p118_p2, %p117_p1  ;;  %s102_s23 = ssub.s32 %s495_s16, %s662_s20 }
   0xa   : > { %p349_p6 = scmp.ge.s32.totalorder %s499_s17, 1  ;;  %p105_p7 = scmp.eq.s32.totalorder %s102_s23, 0 }
   0xb   : > { %p571_p8 = por %p124_p5, %p123_p3  ;;  %p161_p9 = scmp.lt.s32.totalorder %s499_s17, 3 }
   0xc   : > { %s577_s25 = scalar_select %p105_p7, %s487_s14, %s107_s21  }
   0xd   : > { %p162_p10 = pnand %p349_p6, %p161_p9 }
   0xe   : > { %p190_p11 = scmp.lt.s32.totalorder (!%p162_p10), %s491_s15, 1  ;;  %s186_s4 = sand.u32 (!%p162_p10), 1, %s483_s13  }
   0xf   : > { %165 = sbr.rel (%p162_p10) target bundleno = 351 (0x15f), region = 32  ;;  %s350_s7 = sshll.u32 (!%p162_p10), %s186_s4, 4 }
  0x10   : > { %s361_s10 = sshll.u32 (!%p162_p10), %s491_s15, 8  ;;  %s188_s11 = scalar_lea.vmem (!%p162_p10), [#allocation2], %s350_s7 }
  0x11   : > { %s266_s18 = sshll.u32 (!%p162_p10), %s188_s11, 4  ;;  %s600_s23 = scalar_lea.hbm (!%p162_p10), %s653_s3, %s361_s10  ;;  %s602_s18 = int_to_ptr.vmem [resolvable:$true] %s266_s18 }
  0x14   : > { %s191_s26 = scalar_select %p190_p11, %s491_s15, 1  ;;  %vm204_vm0 = vcmask 261120   ;;  %v353_v21 = vld [vmem:[%s651_s1] ss:$0 sm:$0xff] }
  0x15   : > { %v354_v23 = vld [vmem:[%s652_s2] ss:$0 sm:$0xff]  ;;  %s423_s15 = scalar_lea.vmem %s602_s18, 256 }
  0x16   : > { %s360_s27 = sshll.u32 %s191_s26, 4  ;;  %s605_s26 = scalar_lea.sflag [#allocation3], %s186_s4 }
  0x17   : > { %s197_s30 = scalar_lea.vmem %s650_s0, %s360_s27  ;;  %p424_p12 = scmp.ne.s32.totalorder %s602_s18, %s423_s15 }
  0x18   : > { %v200_v0 = vld [vmem:[%s197_s30] sm:$0xff]  ;;  %v201_v1 = vld [vmem:[%s197_s30 + $0x8] sm:$0xff]  ;;  %s501_s27 = smov [#allocation2]  }
  0x19   : > { %v205_v2 = vsel %vm204_vm0, %v200_v0, 0.0  ;;  %v208_v3 = vsel %vm204_vm0, %v201_v1, 0.0  ;;  %p425_p13 = pnand %p424_p12, %p564_p4  ;;  %s427_s28 = sshll.u32 %s501_s27, 4  ;;  %s428_s28 = int_to_ptr.vmem [resolvable:$false] %s427_s28 }
  0x1a   : > { %206 = vadd.xlane.f32.xlu0 %v205_v2  ;;  %s429_s29 = scalar_lea.vmem %s428_s28, 512  ;;  %p430_p1 = scmp.lt.s32.totalorder %s602_s18, %s428_s28 }
  0x1b   : > { %p426_p0 = pneg %p425_p13  ;;  %p431_p2 = scmp.lt.s32.totalorder %s429_s29, %s423_s15 }
  0x1d   : > { %p432_p3 = por %p431_p2, %p430_p1 }
  0x1e   : > { %209 = vadd.xlane.f32.xlu0 %v208_v3 }
  0x1f   : > { %p433_p5 = pnand %p432_p3, %p426_p0 }
  0xa3   : > { %v207_v4 = vpop.xlane.xlu0 %206 }
  0xa4   : > { %v212_v5 = vmul.f32 0.03125, %v207_v4 }
  0xa6   : > { %v214_v6 = vsub.f32 %v200_v0, %v212_v5 }
  0xa7   : > { %v210_v7 = vpop.xlane.xlu0 %209 }
  0xa8   : > { %v213_v8 = vmul.f32 0.03125, %v210_v7  ;;  %v216_v9 = vmul.f32 %v214_v6, %v214_v6 }
  0xaa   : > { %v215_v10 = vsub.f32 %v201_v1, %v213_v8  ;;  %v218_v11 = vsel %vm204_vm0, %v216_v9, 0.0 }
  0xab   : > { %219 = vadd.xlane.f32.xlu1 %v218_v11 }
  0xac   : > { %v217_v12 = vmul.f32 %v215_v10, %v215_v10 }
  0xae   : > { %v221_v13 = vsel %vm204_vm0, %v217_v12, 0.0 }
  0xaf   : > { %222 = vadd.xlane.f32.xlu1 %v221_v13 }
 0x134   : > { %v220_v14 = vpop.xlane.xlu1 %219 }
 0x135   : > { %v224_v15 = vmul.f32 0.03125, %v220_v14 }
 0x137   : > { %v226_v16 = vadd.f32 1e-06, %v224_v15 }
 0x138   : > { %v223_v17 = vpop.xlane.xlu1 %222 }
 0x139   : > { %419 = vrsqrt.f32 %v226_v16  ;;  %v225_v18 = vmul.f32 0.03125, %v223_v17 }
 0x13b   : > { %v227_v19 = vadd.f32 1e-06, %v225_v18 }
 0x13d   : > { %421 = vrsqrt.f32 %v227_v19 }
 0x146   : > { %v420_v20 = vpop.eup %419 }
 0x147   : > { %v230_v22 = vmul.f32 %v420_v20, %v214_v6 }
 0x149   : > { %v238_v24 = vmul.f32 %v353_v21, %v230_v22 }
 0x14a   : > { %v422_v25 = vpop.eup %421 }
 0x14b   : > { %v231_v26 = vmul.f32 %v422_v25, %v215_v10  ;;  %v246_v27 = vadd.f32 %v354_v23, %v238_v24 }
 0x14d   : > { %v239_v28 = vmul.f32 %v353_v21, %v231_v26  ;;  %248 = vst.msk [vmem:[%s188_s11] sm:$0xff] %vm204_vm0, %v246_v27 }
 0x14f   : > { %v247_v29 = vadd.f32 %v354_v23, %v239_v28 }
 0x151   : > { %249 = vst.msk [vmem:[%s188_s11 + $0x8] sm:$0xff] %vm204_vm0, %v247_v29 }
 0x152   : > { %436 = shalt.err (!%p433_p5)
}
 0x153   : > { %s437_s30 = scalar_lea.hbm %s600_s23, 256  ;;  %s441_s6 = scalar_lea.hbm %s653_s3, 512 }
 0x154   : > { %p438_p6 = scmp.ne.s32.totalorder %s600_s23, %s437_s30  ;;  %p442_p10 = scmp.lt.s32.totalorder %s600_s23, %s653_s3 }
 0x155   : > { %p443_p11 = scmp.lt.s32.totalorder %s441_s6, %s437_s30 }
 0x156   : > { %p439_p7 = pnand %p438_p6, %p564_p4 }
 0x157   : > { %p444_p12 = por %p443_p11, %p442_p10 }
 0x158   : > { %p440_p9 = pneg %p439_p7 }
 0x15a   : > { %p445_p13 = pnand %p444_p12, %p440_p9 }
 0x15c   : > { %448 = shalt.err (!%p445_p13)
}
 0x15d   : > { %s502_s9 = smov 128   ;;  %s503_s10 = smov 8  }
 0x15e   : > { %362 = dma.vmem_to_hbm [thread:$0]  (%p564_p4), %s602_s18, 256, %s600_s23, %s605_s26, %s502_s9, %s502_s9, %s503_s10  }
 0x15f PF: > { %p368_p0 = scmp.ge.s32.totalorder %s499_s17, 2  ;;  %s281_s11 = sand.u32 1, %s479_s12  }
 0x160   : > { %s282_s19 = scalar_lea.sflag [#allocation3], %s281_s11 }
 0x161   : > { %p365_p1 = pnand %p368_p0, %p571_p8 }
 0x163   : > { %p366_p2 = pneg %p365_p1 }
 0x165   : > { %474 = dma.done.wait (%p366_p2), %s282_s19, 256  }
 0x166   : > { %476 = vsyncadd (%p366_p2), %s282_s19, 4294967040  ;;  %s16_s17 = sadd.s32 1, %s499_s17   ;;  %s656_s12 = smov %s483_s13 }
 0x167   : > { %p13_p3 = scmp.ge.s32.totalorder %s16_s17, 4   ;;  %s657_s13 = smov %s487_s14 }
 0x168   : > { %s658_s14 = smov %s577_s25  ;;  %s659_s15 = smov %s495_s16 }
 0x169   : > { %s660_s16 = smov %s662_s20  ;;  %15 = sbr.rel (!%p13_p3) target bundleno = 4 (0x4), region = 67 }
 0x16e   :  { %287 = vsyncpa [#allocation3], 1 }
 0x16f   :  { %289 = vsyncpa [#allocation3 + $0x1], 1 }

// kernel: siglip_vision_forward.11
= control target key start
LH: loop header
LB: loop body
LE: loop exit
PB: predicated region body
PF: predicated region fallthrough
CT: control target
= control target key end

     0   :  { %s926_s24 = smov 0   ;;  %s928_s25 = smov 0   ;;  %s1013_s0 = inlined_call_operand.vmem [shape: f32[2,16,32], index: 0, kind: input, shape index: {}]   ;;  %s1014_s1 = inlined_call_operand.vmem [shape: f32[1,32], index: 1, kind: input, shape index: {}]   ;;  %s1015_s2 = inlined_call_operand.vmem [shape: f32[1,32], index: 2, kind: input, shape index: {}]   ;;  %s1016_s3 = inlined_call_operand.vmem [shape: bf16[32,64], index: 3, kind: input, shape index: {}]   ;;  %s1017_s4 = inlined_call_operand.vmem [shape: bf16[1,64], index: 4, kind: input, shape index: {}]   ;;  %s1018_s5 = inlined_call_operand.vmem [shape: bf16[64,32], index: 5, kind: input, shape index: {}]   ;;  %s1019_s6 = inlined_call_operand.vmem [shape: bf16[1,32], index: 6, kind: input, shape index: {}]   ;;  %s1020_s7 = inlined_call_operand.vmem [shape: f32[2,16,32], index: 7, kind: output, shape index: {}]  }
   0x1   :  { %s930_s26 = smov 0  }
   0x2 LB: > { %s36_s27 = sadd.s32 1, %s878_s25  ;;  %p767_p0 = scmp.ge.s32.totalorder %s882_s26, 1  ;;  %s882_s26 = sphi %s930_s26, %s17_s26   ;;  %s878_s25 = sphi %s928_s25, %s1022_s25   ;;  %s874_s24 = sphi %s926_s24, %s1021_s24  }
   0x3   : > { %p38_p1 = scmp.ge.s32.totalorder %s36_s27, 2  ;;  %p293_p2 = scmp.lt.s32.totalorder %s882_s26, 3 }
   0x5   : > { %s1024_s27 = smov (%p38_p1, %s36_s27), 0  ;;  %p294_p3 = pnand %p767_p0, %p293_p2 }
   0x6   : > { %p346_p4 = scmp.lt.s32.totalorder (!%p294_p3), %s874_s24, 1 }
   0x7   : > { %297 = sbr.rel (%p294_p3) target bundleno = 767 (0x2ff), region = 48 }
   0xc   : > { %vm387_vm0 = vcmask 261120   ;;  %v442_v0 = vld [vmem:[%s1019_s6] sm:$0x1]  ;;  %v444_v1 = vlaneseq  ;;  %s1026_s24 = smov (!%p346_p4, %s874_s24), 1  ;;  %v845_v22 = vld [vmem:[%s1016_s3 + $0x8] sm:$0xff]   ;;  %v884_v23 = vmov 0.0  }
   0xd   : > { %v443_v2 = vunpack.c.l.bf16 %v442_v0  ;;  %s787_s30 = sshll.u32 %s1026_s24, 4  ;;  %799 = vmatprep.subr.bf16.mxu0 %v884_v23  ;;  %vm885_vm1 = vmmov 0   ;;  %v846_v24 = vld [vmem:[%s1016_s3] sm:$0xff]   ;;  %807 = vmatprep.subr.bf16.mxu1 %v884_v23  ;;  %vm439_vm2 = vcmask 257024   ;;  %v848_v44 = vld [vmem:[%s1018_s5 + $0x18] sm:$0xff]   ;;  %v849_v45 = vld [vmem:[%s1018_s5 + $0x10] sm:$0xff]  }
   0xe   : > { %v947_v3 = vshrl.u32 %v444_v1, 7  ;;  %s353_s10 = scalar_lea.vmem %s1013_s0, %s787_s30  ;;  %s958_s13 = scalar_lea.vmem %s1020_s7, %s787_s30  ;;  %803 = vmatprep.mubr.msk.bf16.mxu0 %vm885_vm1, %v884_v23  ;;  %800 = vmatpush3.bf16.msra.mxu0 %v845_v22  ;;  %v772_v32 = vld [vmem:[%s1014_s1] ss:$0 sm:$0xff]  ;;  %v850_v46 = vld [vmem:[%s1018_s5 + $0x8] sm:$0xff]   ;;  %vm579_vm3 = vcmask 523264  }
   0xf   : > { %v383_v5 = vld [vmem:[%s353_s10] sm:$0xff]  ;;  %v384_v7 = vld [vmem:[%s353_s10 + $0x8] sm:$0xff]  ;;  %801 = vmatprep.subr.bf16.mxu0 %v884_v23  ;;  %815 = vmatprep.mubr.msk.bf16.mxu1 %vm885_vm1, %v884_v23 }
  0x10   : > { %v446_v4 = vsub.s32 0, %v947_v3  ;;  %v388_v8 = vsel %vm387_vm0, %v383_v5, 0.0  ;;  %v391_v11 = vsel %vm387_vm0, %v384_v7, 0.0  ;;  %v773_v34 = vld [vmem:[%s1015_s2] ss:$0 sm:$0xff]  ;;  %808 = vmatpush3.bf16.msra.mxu1 %v848_v44 }
  0x11   : > { %389 = vadd.xlane.f32.xlu0 %v388_v8  ;;  %809 = vmatprep.subr.bf16.mxu1 %v884_v23  ;;  %v851_v47 = vld [vmem:[%s1018_s5] sm:$0xff]  }
  0x12   : > { %v447_v6 = vrot.slane %v443_v2, %v446_v4  ;;  %802 = vmatpush3.bf16.msra.mxu0 %v846_v24  ;;  %v458_v48 = vld [vmem:[%s1017_s4] sm:$0x1] }
  0x13   : > { %v459_v49 = vunpack.c.l.bf16 %v458_v48 }
  0x14   : > { %v448_v9 = vadd.f32 %v447_v6, %v383_v5  ;;  %v449_v10 = vadd.f32 %v447_v6, %v384_v7  ;;  %810 = vmatpush3.bf16.msra.mxu1 %v849_v45 }
  0x15   : > { %392 = vadd.xlane.f32.xlu0 %v391_v11  ;;  %811 = vmatprep.subr.bf16.mxu1 %v884_v23  ;;  %v463_v50 = vrot.slane %v459_v49, %v446_v4 }
  0x16   : > { %450 = vst.msk [vmem:[%s958_s13] sm:$0xff] %vm387_vm0, %v448_v9  ;;  %451 = vst.msk [vmem:[%s958_s13 + $0x8] sm:$0xff] %vm387_vm0, %v449_v10 }
  0x18   : > { %812 = vmatpush3.bf16.msra.mxu1 %v850_v46 }
  0x19   : > { %813 = vmatprep.subr.bf16.mxu1 %v884_v23 }
  0x1c   : > { %814 = vmatpush3.bf16.msra.mxu1 %v851_v47 }
  0x9a   : > { %v390_v12 = vpop.xlane.xlu0 %389 }
  0x9b   : > { %v395_v13 = vmul.f32 0.03125, %v390_v12  ;;  %v544_v12 = vld [vmem:[%s958_s13] sm:$0xff] }
  0x9d   : > { %v397_v14 = vsub.f32 %v383_v5, %v395_v13 }
  0x9e   : > { %v393_v15 = vpop.xlane.xlu0 %392 }
  0x9f   : > { %v396_v16 = vmul.f32 0.03125, %v393_v15  ;;  %v399_v17 = vmul.f32 %v397_v14, %v397_v14 }
  0xa1   : > { %v398_v18 = vsub.f32 %v384_v7, %v396_v16  ;;  %v401_v19 = vsel %vm387_vm0, %v399_v17, 0.0  ;;  %v545_v16 = vld [vmem:[%s958_s13 + $0x8] sm:$0xff] }
  0xa2   : > { %402 = vadd.xlane.f32.xlu1 %v401_v19 }
  0xa3   : > { %v400_v20 = vmul.f32 %v398_v18, %v398_v18 }
  0xa5   : > { %v404_v21 = vsel %vm387_vm0, %v400_v20, 0.0 }
  0xa6   : > { %405 = vadd.xlane.f32.xlu1 %v404_v21 }
 0x12b   : > { %v403_v25 = vpop.xlane.xlu1 %402 }
 0x12c   : > { %v407_v26 = vmul.f32 0.03125, %v403_v25 }
 0x12e   : > { %v409_v27 = vadd.f32 1e-06, %v407_v26 }
 0x12f   : > { %v406_v28 = vpop.xlane.xlu1 %405 }
 0x130   : > { %852 = vrsqrt.f32 %v409_v27  ;;  %v408_v29 = vmul.f32 0.03125, %v406_v28 }
 0x132   : > { %v410_v30 = vadd.f32 1e-06, %v408_v29 }
 0x134   : > { %854 = vrsqrt.f32 %v410_v30 }
 0x13d   : > { %v853_v31 = vpop.eup %852 }
 0x13e   : > { %v413_v33 = vmul.f32 %v853_v31, %v397_v14 }
 0x140   : > { %v421_v35 = vmul.f32 %v772_v32, %v413_v33 }
 0x141   : > { %v855_v36 = vpop.eup %854 }
 0x142   : > { %v429_v37 = vadd.f32 %v773_v34, %v421_v35  ;;  %v414_v38 = vmul.f32 %v855_v36, %v398_v18 }
 0x144   : > { %v789_v39 = vpack.c.bf16 %v429_v37, %v429_v37  ;;  %v422_v40 = vmul.f32 %v772_v32, %v414_v38 }
 0x146   : > { %440 = vst.msk [vmem:[#allocation2] sm:$0xf] %vm439_vm2, %v789_v39  ;;  %v430_v41 = vadd.f32 %v773_v34, %v422_v40 }
 0x148   : > { %v790_v42 = vpack.c.bf16 %v430_v41, %v430_v41 }
 0x14a   : > { %441 = vst.msk [vmem:[#allocation2 + $0x4] sm:$0xf] %vm439_vm2, %v790_v42 }
 0x151   : > { %v847_v43 = vld [vmem:[#allocation2] sm:$0xff]  }
 0x152   : > { %804 = vmatmul.mubr.msk.bf16.vlgmr.msra.gmra.mxu0 %vm387_vm0, %v847_v43 }
 0x212   : > { %v519_v51 = vpop.f32.mrf.mxu0 }
 0x213   : > { %v520_v52 = vadd.f32 %v519_v51, %v463_v50 }
 0x214   : > { %v805_v53 = vpop.f32.mrf.mxu0 }
 0x215   : > { %v528_v54 = vmul.f32 0.044715, %v520_v52  ;;  %v526_v6 = vmul.f32 0.5, %v520_v52 }
 0x216   : > { %v522_v55 = vpop.f32.mrf.mxu0 }
 0x217   : > { %v530_v56 = vmul.f32 %v528_v54, %v520_v52  ;;  %v523_v57 = vadd.f32 %v522_v55, %v463_v50 }
 0x218   : > { %v806_v58 = vpop.f32.mrf.mxu0 }
 0x219   : > { %v532_v59 = vmul.f32 %v530_v56, %v520_v52  ;;  %v529_v60 = vmul.f32 0.044715, %v523_v57  ;;  %v527_v7 = vmul.f32 0.5, %v523_v57 }
 0x21b   : > { %v534_v61 = vadd.f32 %v532_v59, %v520_v52  ;;  %v531_v62 = vmul.f32 %v529_v60, %v523_v57 }
 0x21d   : > { %v536_v63 = vmul.f32 0.7978846, %v534_v61  ;;  %v533_v0 = vmul.f32 %v531_v62, %v523_v57 }
 0x21f   : > { %856 = vtanh.f32 %v536_v63  ;;  %v535_v1 = vadd.f32 %v533_v0, %v523_v57 }
 0x221   : > { %v537_v2 = vmul.f32 0.7978846, %v535_v1 }
 0x223   : > { %858 = vtanh.f32 %v537_v2 }
 0x22c   : > { %v857_v3 = vpop.eup %856 }
 0x22d   : > { %v540_v4 = vadd.f32 1.0, %v857_v3 }
 0x22f   : > { %v542_v9 = vmul.f32 %v540_v4, %v526_v6 }
 0x230   : > { %v859_v5 = vpop.eup %858 }
 0x231   : > { %v541_v8 = vadd.f32 1.0, %v859_v5 }
 0x233   : > { %v543_v10 = vmul.f32 %v541_v8, %v527_v7 }
 0x235   : > { %v546_v11 = vpack.c.bf16 %v543_v10, %v542_v9 }
 0x237   : > { %816 = vmatmul.mubr.msk.bf16.vlgmr.msra.gmra.mxu1 %vm579_vm3, %v546_v11 }
 0x2f7   : > { %v617_v13 = vpop.f32.mrf.mxu1 }
 0x2f8   : > { %v624_v14 = vadd.f32 %v617_v13, %v544_v12 }
 0x2f9   : > { %v817_v15 = vpop.f32.mrf.mxu1 }
 0x2fa   : > { %626 = vst.msk [vmem:[%s958_s13] sm:$0xff] %vm387_vm0, %v624_v14 }
 0x2fb   : > { %v620_v17 = vpop.f32.mrf.mxu1 }
 0x2fc   : > { %v625_v18 = vadd.f32 %v620_v17, %v545_v16 }
 0x2fd   : > { %v818_v19 = vpop.f32.mrf.mxu1 }
 0x2fe   : > { %627 = vst.msk [vmem:[%s958_s13 + $0x8] sm:$0xff] %vm387_vm0, %v625_v18 }
 0x2ff PF: > { %s17_s26 = sadd.s32 1, %s882_s26   ;;  %s1021_s24 = smov %s878_s25 }
 0x300   : > { %p14_p5 = scmp.ge.s32.totalorder %s17_s26, 4   ;;  %s1022_s25 = smov %s1024_s27 }
 0x302   :  { %16 = sbr.rel (!%p14_p5) target bundleno = 2 (0x2), region = 91 }

</bundles_post_ra>
